<compile_context>
chip_gen: v7x
topology: tpu7x:2x2x1
jax: 0.10.0
libtpu: 0.0.40
codegen_flags: <defaults>
</compile_context>

<pallas_src>
import jax
import jax.numpy as jnp
from jax.experimental import pallas as pl
from jax.experimental.pallas import tpu as pltpu


# ----------------------------------------------------------------------------
# Fused encoder kernel factory (T, Bp, H, n_layers are Python ints -> static).
# ----------------------------------------------------------------------------
def _make_encoder_kernel(T, Bp, H, n_layers):
    G = 4 * H  # gate width [i|f|g|o]; == 128 lanes (one vreg row) at H=32

    def kernel(*args):
        src_ref = args[0]
        w0_ref, whh0_ref, b0_ref = args[1:4]
        deep = args[4:4 + 2 * (n_layers - 1)]
        hidden_ref = args[4 + 2 * (n_layers - 1)]
        cell_ref = args[5 + 2 * (n_layers - 1)]
        gx_sc = args[6 + 2 * (n_layers - 1)]

        f32, bf16 = jnp.float32, jnp.bfloat16

        # Hoisted layer-0 input projection (embedding folded in): one bf16
        # (T*Bp, in) @ (in, 4H) MXU matmul covering every timestep, staged in
        # a VMEM scratch so per-step loads overlap the recurrent matmul.
        gx_sc[...] = (jnp.dot(src_ref[...], w0_ref[...],
                              preferred_element_type=f32) + b0_ref[...])

        # Weights resident for the whole recurrence (bf16 -> half the bytes).
        whh0 = whh0_ref[...]                                  # (4H, 4H) bf16
        wcat = [deep[2 * i][...] for i in range(n_layers - 1)]      # (8H, 4H)
        bias = [deep[2 * i + 1][...] for i in range(n_layers - 1)]  # (1, 4H)

        # Lane mask selecting the tanh (cell-candidate) quarter, hoisted out
        # of all loops (no per-iteration broadcast).
        lane = jax.lax.broadcasted_iota(jnp.int32, (Bp, G), 1)
        g_mask = (lane >= 2 * H) & (lane < 3 * H)

        def cell_update(gates, c_prev):
            # One full-width sigmoid + one full-width tanh + one select instead
            # of four sub-lane slices; gate alignment via XLU lane rotations.
            act = jnp.where(g_mask, jnp.tanh(gates), jax.nn.sigmoid(gates))
            f_a = pltpu.roll(act, 3 * H, 1)   # f -> lanes [0, H)
            g_a = pltpu.roll(act, 2 * H, 1)   # g -> lanes [0, H)
            o_a = pltpu.roll(act, 1 * H, 1)   # o -> lanes [0, H)
            c_new = f_a * c_prev + act * g_a  # i is already in lanes [0, H)
            h_new = o_a * jnp.tanh(c_new)
            return h_new, c_new               # true values in lanes [0, H)

        zero = jnp.zeros((Bp, G), f32)
        h = [zero] * n_layers
        c = [zero] * n_layers
        x_in = [zero] * n_layers              # inter-layer activation (full G)

        # Layer-wavefront recurrence: at global step s, layer l runs time step
        # t = s - l, so the active cell updates are mutually independent and
        # overlap.  Layers are visited deepest-first so each reads the
        # PREVIOUS global step's output of the layer below.
        # (T is small -> fully unrolled static loop; for large T switch to
        # lax.fori_loop(..., unroll=4..8) with pl.ds/pl.multiple_of indices.)
        for s in range(T + n_layers - 1):
            for l in range(n_layers - 1, -1, -1):
                t = s - l
                if t < 0 or t >= T:
                    continue
                if l == 0:
                    gates = gx_sc[t * Bp:(t + 1) * Bp, :] + jnp.dot(
                        h[0].astype(bf16), whh0, preferred_element_type=f32)
                else:
                    # Per-step fused input+recurrent projection:
                    # concat([x_t, h_{t-1}]) @ [[W_ih]; [W_hh]]; the zero-
                    # padded weight rows kill the garbage lanes of the
                    # full-width carries.
                    z = jnp.concatenate(
                        [x_in[l].astype(bf16), h[l].astype(bf16)], axis=1)
                    gates = (jnp.dot(z, wcat[l - 1],
                                     preferred_element_type=f32)
                             + bias[l - 1])
                h_new, c_new = cell_update(gates, c[l])
                h[l], c[l] = h_new, c_new
                if l + 1 < n_layers:
                    x_in[l + 1] = h_new       # consumed at global step s + 1
                if t == T - 1:                # lane-dense (Bp, 4H) final store
                    hidden_ref[l] = h_new
                    cell_ref[l] = c_new

    return kernel


# ----------------------------------------------------------------------------
# Encoder forward (JIT wrapper): pad batch, fold embedding, one pallas_call.
# ----------------------------------------------------------------------------
@jax.jit
def encoder_forward(src, params):
    # src: (T, B, input_dim) -> (hidden, cell) each (n_layers, B, hidden_dim)
    T, B, in_dim = src.shape
    n_layers = len(params["lstm"])
    H = params["lstm"][0]["w_hh_t"].shape[0]
    G = 4 * H

    # Pad batch to the 8-row sublane height so every per-step tile is aligned.
    # (If the real workload has many sequences, batch them here: per-step MXU
    # latency is nearly flat in Bp up to the MXU height, so extra sequences
    # ride along almost for free.)
    Bp = max(8, ((B + 7) // 8) * 8)
    src_p = jnp.pad(src, ((0, 0), (0, Bp - B), (0, 0)))
    src2d = src_p.reshape(T * Bp, in_dim).astype(jnp.bfloat16)

    hi = jax.lax.Precision.HIGHEST
    # Fold the embedding Linear into layer-0's input projection:
    #   (x @ We + be) @ Wih + b  ==  x @ (We @ Wih) + (be @ Wih + b)
    w_ih0 = params["lstm"][0]["w_ih_t"]                          # (emb, 4H)
    w0 = jnp.dot(params["emb_w_t"], w_ih0, precision=hi).astype(jnp.bfloat16)
    b0 = (jnp.dot(params["emb_b"][None, :], w_ih0, precision=hi)
          + params["lstm"][0]["b"])                              # (1, 4H) f32

    def pad_rows(w):   # (H, 4H) -> (4H, 4H): zero rows kill garbage lanes
        return jnp.zeros((G, G), jnp.float32).at[:H, :].set(w)

    whh0_pad = pad_rows(params["lstm"][0]["w_hh_t"]).astype(jnp.bfloat16)

    inputs = [src2d, w0, whh0_pad, b0]
    for l in range(1, n_layers):
        p = params["lstm"][l]
        wcat = jnp.concatenate(
            [pad_rows(p["w_ih_t"]), pad_rows(p["w_hh_t"])], axis=0
        ).astype(jnp.bfloat16)                                   # (8H, 4H)
        inputs += [wcat, p["b"]]

    vmem = pltpu.MemorySpace.VMEM
    hidden_p, cell_p = pl.pallas_call(
        _make_encoder_kernel(T, Bp, H, n_layers),
        out_shape=(
            jax.ShapeDtypeStruct((n_layers, Bp, G), jnp.float32),
            jax.ShapeDtypeStruct((n_layers, Bp, G), jnp.float32),
        ),
        in_specs=[pl.BlockSpec(memory_space=vmem) for _ in inputs],
        out_specs=(pl.BlockSpec(memory_space=vmem),
                   pl.BlockSpec(memory_space=vmem)),
        scratch_shapes=[pltpu.VMEM((T * Bp, G), jnp.float32)],   # hoisted gx
        compiler_params=pltpu.CompilerParams(
            vmem_limit_bytes=32 * 1024 * 1024),
    )(*inputs)

    # TODO(synk): production shapes need (a) time-chunked / double-buffered gx
    # (v7x: 64 MiB physical VMEM) and (b) a batch-tile "parallel" grid axis to
    # use v7x's second TensorCore; unnecessary at these toy sizes.
    return hidden_p[:, :B, :H], cell_p[:, :B, :H]


# ----------------------------------------------------------------------------
# Parameter init (PyTorch layouts: Linear + LSTM default uniform init).
# ----------------------------------------------------------------------------
def init_params(key, config):
    in_dim = config["input_dim"]
    emb_dim = config["embedding_dim"]
    H = config["hidden_dim"]
    n_layers = config["n_layers"]

    keys = jax.random.split(key, 2 + 4 * n_layers)
    params = {}

    # nn.Linear(input_dim, embedding_dim); stored pre-transposed (in, emb).
    s = 1.0 / jnp.sqrt(in_dim)
    params["emb_w_t"] = jax.random.uniform(
        keys[0], (in_dim, emb_dim), jnp.float32, -s, s)
    params["emb_b"] = jax.random.uniform(
        keys[1], (emb_dim,), jnp.float32, -s, s)

    # nn.LSTM(emb_dim, H, n_layers); weights pre-transposed, biases pre-summed.
    sh = 1.0 / jnp.sqrt(H)
    params["lstm"] = []
    for layer in range(n_layers):
        layer_in = emb_dim if layer == 0 else H
        k0, k1, k2, k3 = keys[2 + 4 * layer: 6 + 4 * layer]
        w_ih_t = jax.random.uniform(k0, (layer_in, 4 * H), jnp.float32, -sh, sh)
        w_hh_t = jax.random.uniform(k1, (H, 4 * H), jnp.float32, -sh, sh)
        b_ih = jax.random.uniform(k2, (4 * H,), jnp.float32, -sh, sh)
        b_hh = jax.random.uniform(k3, (4 * H,), jnp.float32, -sh, sh)
        params["lstm"].append(
            {"w_ih_t": w_ih_t, "w_hh_t": w_hh_t,
             "b": (b_ih + b_hh).reshape(1, 4 * H)}
        )
    return params


# ----------------------------------------------------------------------------
# Pure-JAX f32 reference (unfused, unfolded) for a numerical sanity check.
# ----------------------------------------------------------------------------
def _reference_forward(src, params):
    hi = jax.lax.Precision.HIGHEST
    T, B, _ = src.shape
    H = params["lstm"][0]["w_hh_t"].shape[0]
    x = (jnp.einsum("tbi,ie->tbe", src, params["emb_w_t"], precision=hi)
         + params["emb_b"])
    hs, cs = [], []
    for p in params["lstm"]:
        w_ih_t, w_hh_t, b = p["w_ih_t"], p["w_hh_t"], p["b"]

        def step(carry, x_t, w_ih_t=w_ih_t, w_hh_t=w_hh_t, b=b):
            h, c = carry
            gates = (jnp.dot(x_t, w_ih_t, precision=hi)
                     + jnp.dot(h, w_hh_t, precision=hi) + b)
            i = jax.nn.sigmoid(gates[:, 0 * H:1 * H])
            f = jax.nn.sigmoid(gates[:, 1 * H:2 * H])
            g = jnp.tanh(gates[:, 2 * H:3 * H])
            o = jax.nn.sigmoid(gates[:, 3 * H:4 * H])
            c = f * c + i * g
            h = o * jnp.tanh(c)
            return (h, c), h

        init = (jnp.zeros((B, H), jnp.float32), jnp.zeros((B, H), jnp.float32))
        (h_n, c_n), y = jax.lax.scan(step, init, x)
        hs.append(h_n)
        cs.append(c_n)
        x = y
    return jnp.stack(hs, axis=0), jnp.stack(cs, axis=0)


if __name__ == "__main__":
    config = {
        "input_dim": 16,
        "embedding_dim": 32,
        "hidden_dim": 32,
        "n_layers": 2,
        "dropout": 0.0,
        "lr": 1e-3,  # unused (optimizer is not part of the forward pass)
    }
    T, B = 8, 4

    key = jax.random.PRNGKey(0)
    k_param, k_src = jax.random.split(key)
    params = init_params(k_param, config)
    src = jax.random.normal(k_src, (T, B, config["input_dim"]), jnp.float32)

    hidden, cell = encoder_forward(src, params)
    jax.block_until_ready((hidden, cell))

    assert hidden.shape == (config["n_layers"], B, config["hidden_dim"])
    assert cell.shape == (config["n_layers"], B, config["hidden_dim"])
    assert bool(jnp.all(jnp.isfinite(hidden))) and bool(jnp.all(jnp.isfinite(cell)))

    # Numerical check vs. the f32 reference.  Tolerance is retuned for the
    # bf16 MXU operands (plus the embedding-fold reassociation); gate and
    # state math remain f32 so the error stays small and bounded.
    h_ref, c_ref = _reference_forward(src, params)
    assert jnp.allclose(hidden, h_ref, atol=1e-1, rtol=1e-1), \
        float(jnp.max(jnp.abs(hidden - h_ref)))
    assert jnp.allclose(cell, c_ref, atol=1e-1, rtol=1e-1), \
        float(jnp.max(jnp.abs(cell - c_ref)))

    print("KERNEL_OK")
</pallas_src>

<mosaic_0001>
module attributes {stable_mosaic.version = 11 : i64} {
  func.func @kernel(%arg0: memref<64x16xbf16, #tpu.memory_space<vmem>>, %arg1: memref<16x128xbf16, #tpu.memory_space<vmem>>, %arg2: memref<128x128xbf16, #tpu.memory_space<vmem>>, %arg3: memref<1x128xf32, #tpu.memory_space<vmem>>, %arg4: memref<256x128xbf16, #tpu.memory_space<vmem>>, %arg5: memref<1x128xf32, #tpu.memory_space<vmem>>, %arg6: memref<2x8x128xf32, #tpu.memory_space<vmem>>, %arg7: memref<2x8x128xf32, #tpu.memory_space<vmem>>, %arg8: memref<64x128xf32, #tpu.memory_space<vmem>>) attributes {dimension_semantics = [], scalar_prefetch = 0 : i64, scratch_operands = 1 : i64, tpu.core_type = #tpu.core_type<tc>} {
    %c0 = arith.constant 0 : index
    %c0_0 = arith.constant 0 : index
    %0 = vector.load %arg0[%c0, %c0_0] : memref<64x16xbf16, #tpu.memory_space<vmem>>, vector<64x16xbf16>
    %c0_1 = arith.constant 0 : index
    %c0_2 = arith.constant 0 : index
    %1 = vector.load %arg1[%c0_1, %c0_2] : memref<16x128xbf16, #tpu.memory_space<vmem>>, vector<16x128xbf16>
    %cst = arith.constant dense<0.000000e+00> : vector<64x128xf32>
    %2 = tpu.matmul %0, %1, %cst {dimension_numbers = #tpu.dot_dimension_numbers<[1], [0], [0], [1], [0, 0, 1, 1], [], []>} : vector<64x16xbf16>, vector<16x128xbf16>, vector<64x128xf32> -> vector<64x128xf32>
    %c0_3 = arith.constant 0 : index
    %c0_4 = arith.constant 0 : index
    %3 = vector.load %arg3[%c0_3, %c0_4] : memref<1x128xf32, #tpu.memory_space<vmem>>, vector<1x128xf32>
    %4 = vector.broadcast %3 : vector<1x128xf32> to vector<64x128xf32>
    %5 = arith.addf %2, %4 : vector<64x128xf32>
    %c0_5 = arith.constant 0 : index
    %c0_6 = arith.constant 0 : index
    %6 = vector.load %arg8[%c0_5, %c0_6] : memref<64x128xf32, #tpu.memory_space<vmem>>, vector<64x128xf32>
    tpu.vector_store %arg8[%c0_5, %c0_6], %5 {strides = array<i32>} : memref<64x128xf32, #tpu.memory_space<vmem>>, vector<64x128xf32>,
    %c0_7 = arith.constant 0 : index
    %c0_8 = arith.constant 0 : index
    %7 = vector.load %arg2[%c0_7, %c0_8] : memref<128x128xbf16, #tpu.memory_space<vmem>>, vector<128x128xbf16>
    %c0_9 = arith.constant 0 : index
    %c0_10 = arith.constant 0 : index
    %8 = vector.load %arg4[%c0_9, %c0_10] : memref<256x128xbf16, #tpu.memory_space<vmem>>, vector<256x128xbf16>
    %c0_11 = arith.constant 0 : index
    %c0_12 = arith.constant 0 : index
    %9 = vector.load %arg5[%c0_11, %c0_12] : memref<1x128xf32, #tpu.memory_space<vmem>>, vector<1x128xf32>
    %10 = tpu.iota {dimensions = array<i32: 1>} : vector<8x128xi32>
    %c64_i32 = arith.constant 64 : i32
    %11 = vector.broadcast %c64_i32 : i32 to vector<8x128xi32>
    %12 = arith.cmpi sge, %10, %11 : vector<8x128xi32>
    %c96_i32 = arith.constant 96 : i32
    %13 = vector.broadcast %c96_i32 : i32 to vector<8x128xi32>
    %14 = arith.cmpi slt, %10, %13 : vector<8x128xi32>
    %15 = arith.andi %12, %14 : vector<8x128xi1>
    %cst_13 = arith.constant 0.000000e+00 : f32
    %16 = vector.broadcast %cst_13 : f32 to vector<8x128xf32>
    %c0_14 = arith.constant 0 : index
    %c0_15 = arith.constant 0 : index
    %17 = vector.load %arg8[%c0_14, %c0_15] : memref<64x128xf32, #tpu.memory_space<vmem>>, vector<8x128xf32>
    %18 = arith.truncf %16 : vector<8x128xf32> to vector<8x128xbf16>
    %cst_16 = arith.constant dense<0.000000e+00> : vector<8x128xf32>
    %19 = tpu.matmul %18, %7, %cst_16 {dimension_numbers = #tpu.dot_dimension_numbers<[1], [0], [0], [1], [0, 0, 1, 1], [], []>} : vector<8x128xbf16>, vector<128x128xbf16>, vector<8x128xf32> -> vector<8x128xf32>
    %20 = arith.addf %17, %19 : vector<8x128xf32>
    %21 = math.tanh %20 : vector<8x128xf32>
    %22 = arith.negf %20 : vector<8x128xf32>
    %23 = math.exp %22 : vector<8x128xf32>
    %cst_17 = arith.constant 1.000000e+00 : f32
    %24 = vector.broadcast %cst_17 : f32 to vector<8x128xf32>
    %25 = arith.addf %24, %23 : vector<8x128xf32>
    %26 = arith.divf %24, %25 : vector<8x128xf32>
    %27 = arith.select %15, %21, %26 : vector<8x128xi1>, vector<8x128xf32>
    %c96_i32_18 = arith.constant 96 : i32
    %28 = tpu.dynamic_rotate %27 by %c96_i32_18 dim 1 : vector<8x128xf32>, i32 -> vector<8x128xf32>
    %c64_i32_19 = arith.constant 64 : i32
    %29 = tpu.dynamic_rotate %27 by %c64_i32_19 dim 1 : vector<8x128xf32>, i32 -> vector<8x128xf32>
    %c32_i32 = arith.constant 32 : i32
    %30 = tpu.dynamic_rotate %27 by %c32_i32 dim 1 : vector<8x128xf32>, i32 -> vector<8x128xf32>
    %31 = arith.mulf %28, %16 : vector<8x128xf32>
    %32 = arith.mulf %27, %29 : vector<8x128xf32>
    %33 = arith.addf %31, %32 : vector<8x128xf32>
    %34 = math.tanh %33 : vector<8x128xf32>
    %35 = arith.mulf %30, %34 : vector<8x128xf32>
    %36 = arith.truncf %35 : vector<8x128xf32> to vector<8x128xbf16>
    %37 = arith.truncf %16 : vector<8x128xf32> to vector<8x128xbf16>
    %38 = tpu.concatenate %36, %37 in 1 : vector<8x128xbf16>, vector<8x128xbf16> -> vector<8x256xbf16>
    %cst_20 = arith.constant dense<0.000000e+00> : vector<8x128xf32>
    %39 = tpu.matmul %38, %8, %cst_20 {dimension_numbers = #tpu.dot_dimension_numbers<[1], [0], [0], [1], [0, 0, 1, 1], [], []>} : vector<8x256xbf16>, vector<256x128xbf16>, vector<8x128xf32> -> vector<8x128xf32>
    %40 = vector.broadcast %9 : vector<1x128xf32> to vector<8x128xf32>
    %41 = arith.addf %39, %40 : vector<8x128xf32>
    %42 = math.tanh %41 : vector<8x128xf32>
    %43 = arith.negf %41 : vector<8x128xf32>
    %44 = math.exp %43 : vector<8x128xf32>
    %cst_21 = arith.constant 1.000000e+00 : f32
    %45 = vector.broadcast %cst_21 : f32 to vector<8x128xf32>
    %46 = arith.addf %45, %44 : vector<8x128xf32>
    %47 = arith.divf %45, %46 : vector<8x128xf32>
    %48 = arith.select %15, %42, %47 : vector<8x128xi1>, vector<8x128xf32>
    %c96_i32_22 = arith.constant 96 : i32
    %49 = tpu.dynamic_rotate %48 by %c96_i32_22 dim 1 : vector<8x128xf32>, i32 -> vector<8x128xf32>
    %c64_i32_23 = arith.constant 64 : i32
    %50 = tpu.dynamic_rotate %48 by %c64_i32_23 dim 1 : vector<8x128xf32>, i32 -> vector<8x128xf32>
    %c32_i32_24 = arith.constant 32 : i32
    %51 = tpu.dynamic_rotate %48 by %c32_i32_24 dim 1 : vector<8x128xf32>, i32 -> vector<8x128xf32>
    %52 = arith.mulf %49, %16 : vector<8x128xf32>
    %53 = arith.mulf %48, %50 : vector<8x128xf32>
    %54 = arith.addf %52, %53 : vector<8x128xf32>
    %55 = math.tanh %54 : vector<8x128xf32>
    %56 = arith.mulf %51, %55 : vector<8x128xf32>
    %c8 = arith.constant 8 : index
    %c0_25 = arith.constant 0 : index
    %57 = vector.load %arg8[%c8, %c0_25] : memref<64x128xf32, #tpu.memory_space<vmem>>, vector<8x128xf32>
    %58 = arith.truncf %35 : vector<8x128xf32> to vector<8x128xbf16>
    %cst_26 = arith.constant dense<0.000000e+00> : vector<8x128xf32>
    %59 = tpu.matmul %58, %7, %cst_26 {dimension_numbers = #tpu.dot_dimension_numbers<[1], [0], [0], [1], [0, 0, 1, 1], [], []>} : vector<8x128xbf16>, vector<128x128xbf16>, vector<8x128xf32> -> vector<8x128xf32>
    %60 = arith.addf %57, %59 : vector<8x128xf32>
    %61 = math.tanh %60 : vector<8x128xf32>
    %62 = arith.negf %60 : vector<8x128xf32>
    %63 = math.exp %62 : vector<8x128xf32>
    %cst_27 = arith.constant 1.000000e+00 : f32
    %64 = vector.broadcast %cst_27 : f32 to vector<8x128xf32>
    %65 = arith.addf %64, %63 : vector<8x128xf32>
    %66 = arith.divf %64, %65 : vector<8x128xf32>
    %67 = arith.select %15, %61, %66 : vector<8x128xi1>, vector<8x128xf32>
    %c96_i32_28 = arith.constant 96 : i32
    %68 = tpu.dynamic_rotate %67 by %c96_i32_28 dim 1 : vector<8x128xf32>, i32 -> vector<8x128xf32>
    %c64_i32_29 = arith.constant 64 : i32
    %69 = tpu.dynamic_rotate %67 by %c64_i32_29 dim 1 : vector<8x128xf32>, i32 -> vector<8x128xf32>
    %c32_i32_30 = arith.constant 32 : i32
    %70 = tpu.dynamic_rotate %67 by %c32_i32_30 dim 1 : vector<8x128xf32>, i32 -> vector<8x128xf32>
    %71 = arith.mulf %68, %33 : vector<8x128xf32>
    %72 = arith.mulf %67, %69 : vector<8x128xf32>
    %73 = arith.addf %71, %72 : vector<8x128xf32>
    %74 = math.tanh %73 : vector<8x128xf32>
    %75 = arith.mulf %70, %74 : vector<8x128xf32>
    %76 = arith.truncf %75 : vector<8x128xf32> to vector<8x128xbf16>
    %77 = arith.truncf %56 : vector<8x128xf32> to vector<8x128xbf16>
    %78 = tpu.concatenate %76, %77 in 1 : vector<8x128xbf16>, vector<8x128xbf16> -> vector<8x256xbf16>
    %cst_31 = arith.constant dense<0.000000e+00> : vector<8x128xf32>
    %79 = tpu.matmul %78, %8, %cst_31 {dimension_numbers = #tpu.dot_dimension_numbers<[1], [0], [0], [1], [0, 0, 1, 1], [], []>} : vector<8x256xbf16>, vector<256x128xbf16>, vector<8x128xf32> -> vector<8x128xf32>
    %80 = vector.broadcast %9 : vector<1x128xf32> to vector<8x128xf32>
    %81 = arith.addf %79, %80 : vector<8x128xf32>
    %82 = math.tanh %81 : vector<8x128xf32>
    %83 = arith.negf %81 : vector<8x128xf32>
    %84 = math.exp %83 : vector<8x128xf32>
    %cst_32 = arith.constant 1.000000e+00 : f32
    %85 = vector.broadcast %cst_32 : f32 to vector<8x128xf32>
    %86 = arith.addf %85, %84 : vector<8x128xf32>
    %87 = arith.divf %85, %86 : vector<8x128xf32>
    %88 = arith.select %15, %82, %87 : vector<8x128xi1>, vector<8x128xf32>
    %c96_i32_33 = arith.constant 96 : i32
    %89 = tpu.dynamic_rotate %88 by %c96_i32_33 dim 1 : vector<8x128xf32>, i32 -> vector<8x128xf32>
    %c64_i32_34 = arith.constant 64 : i32
    %90 = tpu.dynamic_rotate %88 by %c64_i32_34 dim 1 : vector<8x128xf32>, i32 -> vector<8x128xf32>
    %c32_i32_35 = arith.constant 32 : i32
    %91 = tpu.dynamic_rotate %88 by %c32_i32_35 dim 1 : vector<8x128xf32>, i32 -> vector<8x128xf32>
    %92 = arith.mulf %89, %54 : vector<8x128xf32>
    %93 = arith.mulf %88, %90 : vector<8x128xf32>
    %94 = arith.addf %92, %93 : vector<8x128xf32>
    %95 = math.tanh %94 : vector<8x128xf32>
    %96 = arith.mulf %91, %95 : vector<8x128xf32>
    %c16 = arith.constant 16 : index
    %c0_36 = arith.constant 0 : index
    %97 = vector.load %arg8[%c16, %c0_36] : memref<64x128xf32, #tpu.memory_space<vmem>>, vector<8x128xf32>
    %98 = arith.truncf %75 : vector<8x128xf32> to vector<8x128xbf16>
    %cst_37 = arith.constant dense<0.000000e+00> : vector<8x128xf32>
    %99 = tpu.matmul %98, %7, %cst_37 {dimension_numbers = #tpu.dot_dimension_numbers<[1], [0], [0], [1], [0, 0, 1, 1], [], []>} : vector<8x128xbf16>, vector<128x128xbf16>, vector<8x128xf32> -> vector<8x128xf32>
    %100 = arith.addf %97, %99 : vector<8x128xf32>
    %101 = math.tanh %100 : vector<8x128xf32>
    %102 = arith.negf %100 : vector<8x128xf32>
    %103 = math.exp %102 : vector<8x128xf32>
    %cst_38 = arith.constant 1.000000e+00 : f32
    %104 = vector.broadcast %cst_38 : f32 to vector<8x128xf32>
    %105 = arith.addf %104, %103 : vector<8x128xf32>
    %106 = arith.divf %104, %105 : vector<8x128xf32>
    %107 = arith.select %15, %101, %106 : vector<8x128xi1>, vector<8x128xf32>
    %c96_i32_39 = arith.constant 96 : i32
    %108 = tpu.dynamic_rotate %107 by %c96_i32_39 dim 1 : vector<8x128xf32>, i32 -> vector<8x128xf32>
    %c64_i32_40 = arith.constant 64 : i32
    %109 = tpu.dynamic_rotate %107 by %c64_i32_40 dim 1 : vector<8x128xf32>, i32 -> vector<8x128xf32>
    %c32_i32_41 = arith.constant 32 : i32
    %110 = tpu.dynamic_rotate %107 by %c32_i32_41 dim 1 : vector<8x128xf32>, i32 -> vector<8x128xf32>
    %111 = arith.mulf %108, %73 : vector<8x128xf32>
    %112 = arith.mulf %107, %109 : vector<8x128xf32>
    %113 = arith.addf %111, %112 : vector<8x128xf32>
    %114 = math.tanh %113 : vector<8x128xf32>
    %115 = arith.mulf %110, %114 : vector<8x128xf32>
    %116 = arith.truncf %115 : vector<8x128xf32> to vector<8x128xbf16>
    %117 = arith.truncf %96 : vector<8x128xf32> to vector<8x128xbf16>
    %118 = tpu.concatenate %116, %117 in 1 : vector<8x128xbf16>, vector<8x128xbf16> -> vector<8x256xbf16>
    %cst_42 = arith.constant dense<0.000000e+00> : vector<8x128xf32>
    %119 = tpu.matmul %118, %8, %cst_42 {dimension_numbers = #tpu.dot_dimension_numbers<[1], [0], [0], [1], [0, 0, 1, 1], [], []>} : vector<8x256xbf16>, vector<256x128xbf16>, vector<8x128xf32> -> vector<8x128xf32>
    %120 = vector.broadcast %9 : vector<1x128xf32> to vector<8x128xf32>
    %121 = arith.addf %119, %120 : vector<8x128xf32>
    %122 = math.tanh %121 : vector<8x128xf32>
    %123 = arith.negf %121 : vector<8x128xf32>
    %124 = math.exp %123 : vector<8x128xf32>
    %cst_43 = arith.constant 1.000000e+00 : f32
    %125 = vector.broadcast %cst_43 : f32 to vector<8x128xf32>
    %126 = arith.addf %125, %124 : vector<8x128xf32>
    %127 = arith.divf %125, %126 : vector<8x128xf32>
    %128 = arith.select %15, %122, %127 : vector<8x128xi1>, vector<8x128xf32>
    %c96_i32_44 = arith.constant 96 : i32
    %129 = tpu.dynamic_rotate %128 by %c96_i32_44 dim 1 : vector<8x128xf32>, i32 -> vector<8x128xf32>
    %c64_i32_45 = arith.constant 64 : i32
    %130 = tpu.dynamic_rotate %128 by %c64_i32_45 dim 1 : vector<8x128xf32>, i32 -> vector<8x128xf32>
    %c32_i32_46 = arith.constant 32 : i32
    %131 = tpu.dynamic_rotate %128 by %c32_i32_46 dim 1 : vector<8x128xf32>, i32 -> vector<8x128xf32>
    %132 = arith.mulf %129, %94 : vector<8x128xf32>
    %133 = arith.mulf %128, %130 : vector<8x128xf32>
    %134 = arith.addf %132, %133 : vector<8x128xf32>
    %135 = math.tanh %134 : vector<8x128xf32>
    %136 = arith.mulf %131, %135 : vector<8x128xf32>
    %c24 = arith.constant 24 : index
    %c0_47 = arith.constant 0 : index
    %137 = vector.load %arg8[%c24, %c0_47] : memref<64x128xf32, #tpu.memory_space<vmem>>, vector<8x128xf32>
    %138 = arith.truncf %115 : vector<8x128xf32> to vector<8x128xbf16>
    %cst_48 = arith.constant dense<0.000000e+00> : vector<8x128xf32>
    %139 = tpu.matmul %138, %7, %cst_48 {dimension_numbers = #tpu.dot_dimension_numbers<[1], [0], [0], [1], [0, 0, 1, 1], [], []>} : vector<8x128xbf16>, vector<128x128xbf16>, vector<8x128xf32> -> vector<8x128xf32>
    %140 = arith.addf %137, %139 : vector<8x128xf32>
    %141 = math.tanh %140 : vector<8x128xf32>
    %142 = arith.negf %140 : vector<8x128xf32>
    %143 = math.exp %142 : vector<8x128xf32>
    %cst_49 = arith.constant 1.000000e+00 : f32
    %144 = vector.broadcast %cst_49 : f32 to vector<8x128xf32>
    %145 = arith.addf %144, %143 : vector<8x128xf32>
    %146 = arith.divf %144, %145 : vector<8x128xf32>
    %147 = arith.select %15, %141, %146 : vector<8x128xi1>, vector<8x128xf32>
    %c96_i32_50 = arith.constant 96 : i32
    %148 = tpu.dynamic_rotate %147 by %c96_i32_50 dim 1 : vector<8x128xf32>, i32 -> vector<8x128xf32>
    %c64_i32_51 = arith.constant 64 : i32
    %149 = tpu.dynamic_rotate %147 by %c64_i32_51 dim 1 : vector<8x128xf32>, i32 -> vector<8x128xf32>
    %c32_i32_52 = arith.constant 32 : i32
    %150 = tpu.dynamic_rotate %147 by %c32_i32_52 dim 1 : vector<8x128xf32>, i32 -> vector<8x128xf32>
    %151 = arith.mulf %148, %113 : vector<8x128xf32>
    %152 = arith.mulf %147, %149 : vector<8x128xf32>
    %153 = arith.addf %151, %152 : vector<8x128xf32>
    %154 = math.tanh %153 : vector<8x128xf32>
    %155 = arith.mulf %150, %154 : vector<8x128xf32>
    %156 = arith.truncf %155 : vector<8x128xf32> to vector<8x128xbf16>
    %157 = arith.truncf %136 : vector<8x128xf32> to vector<8x128xbf16>
    %158 = tpu.concatenate %156, %157 in 1 : vector<8x128xbf16>, vector<8x128xbf16> -> vector<8x256xbf16>
    %cst_53 = arith.constant dense<0.000000e+00> : vector<8x128xf32>
    %159 = tpu.matmul %158, %8, %cst_53 {dimension_numbers = #tpu.dot_dimension_numbers<[1], [0], [0], [1], [0, 0, 1, 1], [], []>} : vector<8x256xbf16>, vector<256x128xbf16>, vector<8x128xf32> -> vector<8x128xf32>
    %160 = vector.broadcast %9 : vector<1x128xf32> to vector<8x128xf32>
    %161 = arith.addf %159, %160 : vector<8x128xf32>
    %162 = math.tanh %161 : vector<8x128xf32>
    %163 = arith.negf %161 : vector<8x128xf32>
    %164 = math.exp %163 : vector<8x128xf32>
    %cst_54 = arith.constant 1.000000e+00 : f32
    %165 = vector.broadcast %cst_54 : f32 to vector<8x128xf32>
    %166 = arith.addf %165, %164 : vector<8x128xf32>
    %167 = arith.divf %165, %166 : vector<8x128xf32>
    %168 = arith.select %15, %162, %167 : vector<8x128xi1>, vector<8x128xf32>
    %c96_i32_55 = arith.constant 96 : i32
    %169 = tpu.dynamic_rotate %168 by %c96_i32_55 dim 1 : vector<8x128xf32>, i32 -> vector<8x128xf32>
    %c64_i32_56 = arith.constant 64 : i32
    %170 = tpu.dynamic_rotate %168 by %c64_i32_56 dim 1 : vector<8x128xf32>, i32 -> vector<8x128xf32>
    %c32_i32_57 = arith.constant 32 : i32
    %171 = tpu.dynamic_rotate %168 by %c32_i32_57 dim 1 : vector<8x128xf32>, i32 -> vector<8x128xf32>
    %172 = arith.mulf %169, %134 : vector<8x128xf32>
    %173 = arith.mulf %168, %170 : vector<8x128xf32>
    %174 = arith.addf %172, %173 : vector<8x128xf32>
    %175 = math.tanh %174 : vector<8x128xf32>
    %176 = arith.mulf %171, %175 : vector<8x128xf32>
    %c32 = arith.constant 32 : index
    %c0_58 = arith.constant 0 : index
    %177 = vector.load %arg8[%c32, %c0_58] : memref<64x128xf32, #tpu.memory_space<vmem>>, vector<8x128xf32>
    %178 = arith.truncf %155 : vector<8x128xf32> to vector<8x128xbf16>
    %cst_59 = arith.constant dense<0.000000e+00> : vector<8x128xf32>
    %179 = tpu.matmul %178, %7, %cst_59 {dimension_numbers = #tpu.dot_dimension_numbers<[1], [0], [0], [1], [0, 0, 1, 1], [], []>} : vector<8x128xbf16>, vector<128x128xbf16>, vector<8x128xf32> -> vector<8x128xf32>
    %180 = arith.addf %177, %179 : vector<8x128xf32>
    %181 = math.tanh %180 : vector<8x128xf32>
    %182 = arith.negf %180 : vector<8x128xf32>
    %183 = math.exp %182 : vector<8x128xf32>
    %cst_60 = arith.constant 1.000000e+00 : f32
    %184 = vector.broadcast %cst_60 : f32 to vector<8x128xf32>
    %185 = arith.addf %184, %183 : vector<8x128xf32>
    %186 = arith.divf %184, %185 : vector<8x128xf32>
    %187 = arith.select %15, %181, %186 : vector<8x128xi1>, vector<8x128xf32>
    %c96_i32_61 = arith.constant 96 : i32
    %188 = tpu.dynamic_rotate %187 by %c96_i32_61 dim 1 : vector<8x128xf32>, i32 -> vector<8x128xf32>
    %c64_i32_62 = arith.constant 64 : i32
    %189 = tpu.dynamic_rotate %187 by %c64_i32_62 dim 1 : vector<8x128xf32>, i32 -> vector<8x128xf32>
    %c32_i32_63 = arith.constant 32 : i32
    %190 = tpu.dynamic_rotate %187 by %c32_i32_63 dim 1 : vector<8x128xf32>, i32 -> vector<8x128xf32>
    %191 = arith.mulf %188, %153 : vector<8x128xf32>
    %192 = arith.mulf %187, %189 : vector<8x128xf32>
    %193 = arith.addf %191, %192 : vector<8x128xf32>
    %194 = math.tanh %193 : vector<8x128xf32>
    %195 = arith.mulf %190, %194 : vector<8x128xf32>
    %196 = arith.truncf %195 : vector<8x128xf32> to vector<8x128xbf16>
    %197 = arith.truncf %176 : vector<8x128xf32> to vector<8x128xbf16>
    %198 = tpu.concatenate %196, %197 in 1 : vector<8x128xbf16>, vector<8x128xbf16> -> vector<8x256xbf16>
    %cst_64 = arith.constant dense<0.000000e+00> : vector<8x128xf32>
    %199 = tpu.matmul %198, %8, %cst_64 {dimension_numbers = #tpu.dot_dimension_numbers<[1], [0], [0], [1], [0, 0, 1, 1], [], []>} : vector<8x256xbf16>, vector<256x128xbf16>, vector<8x128xf32> -> vector<8x128xf32>
    %200 = vector.broadcast %9 : vector<1x128xf32> to vector<8x128xf32>
    %201 = arith.addf %199, %200 : vector<8x128xf32>
    %202 = math.tanh %201 : vector<8x128xf32>
    %203 = arith.negf %201 : vector<8x128xf32>
    %204 = math.exp %203 : vector<8x128xf32>
    %cst_65 = arith.constant 1.000000e+00 : f32
    %205 = vector.broadcast %cst_65 : f32 to vector<8x128xf32>
    %206 = arith.addf %205, %204 : vector<8x128xf32>
    %207 = arith.divf %205, %206 : vector<8x128xf32>
    %208 = arith.select %15, %202, %207 : vector<8x128xi1>, vector<8x128xf32>
    %c96_i32_66 = arith.constant 96 : i32
    %209 = tpu.dynamic_rotate %208 by %c96_i32_66 dim 1 : vector<8x128xf32>, i32 -> vector<8x128xf32>
    %c64_i32_67 = arith.constant 64 : i32
    %210 = tpu.dynamic_rotate %208 by %c64_i32_67 dim 1 : vector<8x128xf32>, i32 -> vector<8x128xf32>
    %c32_i32_68 = arith.constant 32 : i32
    %211 = tpu.dynamic_rotate %208 by %c32_i32_68 dim 1 : vector<8x128xf32>, i32 -> vector<8x128xf32>
    %212 = arith.mulf %209, %174 : vector<8x128xf32>
    %213 = arith.mulf %208, %210 : vector<8x128xf32>
    %214 = arith.addf %212, %213 : vector<8x128xf32>
    %215 = math.tanh %214 : vector<8x128xf32>
    %216 = arith.mulf %211, %215 : vector<8x128xf32>
    %c40 = arith.constant 40 : index
    %c0_69 = arith.constant 0 : index
    %217 = vector.load %arg8[%c40, %c0_69] : memref<64x128xf32, #tpu.memory_space<vmem>>, vector<8x128xf32>
    %218 = arith.truncf %195 : vector<8x128xf32> to vector<8x128xbf16>
    %cst_70 = arith.constant dense<0.000000e+00> : vector<8x128xf32>
    %219 = tpu.matmul %218, %7, %cst_70 {dimension_numbers = #tpu.dot_dimension_numbers<[1], [0], [0], [1], [0, 0, 1, 1], [], []>} : vector<8x128xbf16>, vector<128x128xbf16>, vector<8x128xf32> -> vector<8x128xf32>
    %220 = arith.addf %217, %219 : vector<8x128xf32>
    %221 = math.tanh %220 : vector<8x128xf32>
    %222 = arith.negf %220 : vector<8x128xf32>
    %223 = math.exp %222 : vector<8x128xf32>
    %cst_71 = arith.constant 1.000000e+00 : f32
    %224 = vector.broadcast %cst_71 : f32 to vector<8x128xf32>
    %225 = arith.addf %224, %223 : vector<8x128xf32>
    %226 = arith.divf %224, %225 : vector<8x128xf32>
    %227 = arith.select %15, %221, %226 : vector<8x128xi1>, vector<8x128xf32>
    %c96_i32_72 = arith.constant 96 : i32
    %228 = tpu.dynamic_rotate %227 by %c96_i32_72 dim 1 : vector<8x128xf32>, i32 -> vector<8x128xf32>
    %c64_i32_73 = arith.constant 64 : i32
    %229 = tpu.dynamic_rotate %227 by %c64_i32_73 dim 1 : vector<8x128xf32>, i32 -> vector<8x128xf32>
    %c32_i32_74 = arith.constant 32 : i32
    %230 = tpu.dynamic_rotate %227 by %c32_i32_74 dim 1 : vector<8x128xf32>, i32 -> vector<8x128xf32>
    %231 = arith.mulf %228, %193 : vector<8x128xf32>
    %232 = arith.mulf %227, %229 : vector<8x128xf32>
    %233 = arith.addf %231, %232 : vector<8x128xf32>
    %234 = math.tanh %233 : vector<8x128xf32>
    %235 = arith.mulf %230, %234 : vector<8x128xf32>
    %236 = arith.truncf %235 : vector<8x128xf32> to vector<8x128xbf16>
    %237 = arith.truncf %216 : vector<8x128xf32> to vector<8x128xbf16>
    %238 = tpu.concatenate %236, %237 in 1 : vector<8x128xbf16>, vector<8x128xbf16> -> vector<8x256xbf16>
    %cst_75 = arith.constant dense<0.000000e+00> : vector<8x128xf32>
    %239 = tpu.matmul %238, %8, %cst_75 {dimension_numbers = #tpu.dot_dimension_numbers<[1], [0], [0], [1], [0, 0, 1, 1], [], []>} : vector<8x256xbf16>, vector<256x128xbf16>, vector<8x128xf32> -> vector<8x128xf32>
    %240 = vector.broadcast %9 : vector<1x128xf32> to vector<8x128xf32>
    %241 = arith.addf %239, %240 : vector<8x128xf32>
    %242 = math.tanh %241 : vector<8x128xf32>
    %243 = arith.negf %241 : vector<8x128xf32>
    %244 = math.exp %243 : vector<8x128xf32>
    %cst_76 = arith.constant 1.000000e+00 : f32
    %245 = vector.broadcast %cst_76 : f32 to vector<8x128xf32>
    %246 = arith.addf %245, %244 : vector<8x128xf32>
    %247 = arith.divf %245, %246 : vector<8x128xf32>
    %248 = arith.select %15, %242, %247 : vector<8x128xi1>, vector<8x128xf32>
    %c96_i32_77 = arith.constant 96 : i32
    %249 = tpu.dynamic_rotate %248 by %c96_i32_77 dim 1 : vector<8x128xf32>, i32 -> vector<8x128xf32>
    %c64_i32_78 = arith.constant 64 : i32
    %250 = tpu.dynamic_rotate %248 by %c64_i32_78 dim 1 : vector<8x128xf32>, i32 -> vector<8x128xf32>
    %c32_i32_79 = arith.constant 32 : i32
    %251 = tpu.dynamic_rotate %248 by %c32_i32_79 dim 1 : vector<8x128xf32>, i32 -> vector<8x128xf32>
    %252 = arith.mulf %249, %214 : vector<8x128xf32>
    %253 = arith.mulf %248, %250 : vector<8x128xf32>
    %254 = arith.addf %252, %253 : vector<8x128xf32>
    %255 = math.tanh %254 : vector<8x128xf32>
    %256 = arith.mulf %251, %255 : vector<8x128xf32>
    %c48 = arith.constant 48 : index
    %c0_80 = arith.constant 0 : index
    %257 = vector.load %arg8[%c48, %c0_80] : memref<64x128xf32, #tpu.memory_space<vmem>>, vector<8x128xf32>
    %258 = arith.truncf %235 : vector<8x128xf32> to vector<8x128xbf16>
    %cst_81 = arith.constant dense<0.000000e+00> : vector<8x128xf32>
    %259 = tpu.matmul %258, %7, %cst_81 {dimension_numbers = #tpu.dot_dimension_numbers<[1], [0], [0], [1], [0, 0, 1, 1], [], []>} : vector<8x128xbf16>, vector<128x128xbf16>, vector<8x128xf32> -> vector<8x128xf32>
    %260 = arith.addf %257, %259 : vector<8x128xf32>
    %261 = math.tanh %260 : vector<8x128xf32>
    %262 = arith.negf %260 : vector<8x128xf32>
    %263 = math.exp %262 : vector<8x128xf32>
    %cst_82 = arith.constant 1.000000e+00 : f32
    %264 = vector.broadcast %cst_82 : f32 to vector<8x128xf32>
    %265 = arith.addf %264, %263 : vector<8x128xf32>
    %266 = arith.divf %264, %265 : vector<8x128xf32>
    %267 = arith.select %15, %261, %266 : vector<8x128xi1>, vector<8x128xf32>
    %c96_i32_83 = arith.constant 96 : i32
    %268 = tpu.dynamic_rotate %267 by %c96_i32_83 dim 1 : vector<8x128xf32>, i32 -> vector<8x128xf32>
    %c64_i32_84 = arith.constant 64 : i32
    %269 = tpu.dynamic_rotate %267 by %c64_i32_84 dim 1 : vector<8x128xf32>, i32 -> vector<8x128xf32>
    %c32_i32_85 = arith.constant 32 : i32
    %270 = tpu.dynamic_rotate %267 by %c32_i32_85 dim 1 : vector<8x128xf32>, i32 -> vector<8x128xf32>
    %271 = arith.mulf %268, %233 : vector<8x128xf32>
    %272 = arith.mulf %267, %269 : vector<8x128xf32>
    %273 = arith.addf %271, %272 : vector<8x128xf32>
    %274 = math.tanh %273 : vector<8x128xf32>
    %275 = arith.mulf %270, %274 : vector<8x128xf32>
    %276 = arith.truncf %275 : vector<8x128xf32> to vector<8x128xbf16>
    %277 = arith.truncf %256 : vector<8x128xf32> to vector<8x128xbf16>
    %278 = tpu.concatenate %276, %277 in 1 : vector<8x128xbf16>, vector<8x128xbf16> -> vector<8x256xbf16>
    %cst_86 = arith.constant dense<0.000000e+00> : vector<8x128xf32>
    %279 = tpu.matmul %278, %8, %cst_86 {dimension_numbers = #tpu.dot_dimension_numbers<[1], [0], [0], [1], [0, 0, 1, 1], [], []>} : vector<8x256xbf16>, vector<256x128xbf16>, vector<8x128xf32> -> vector<8x128xf32>
    %280 = vector.broadcast %9 : vector<1x128xf32> to vector<8x128xf32>
    %281 = arith.addf %279, %280 : vector<8x128xf32>
    %282 = math.tanh %281 : vector<8x128xf32>
    %283 = arith.negf %281 : vector<8x128xf32>
    %284 = math.exp %283 : vector<8x128xf32>
    %cst_87 = arith.constant 1.000000e+00 : f32
    %285 = vector.broadcast %cst_87 : f32 to vector<8x128xf32>
    %286 = arith.addf %285, %284 : vector<8x128xf32>
    %287 = arith.divf %285, %286 : vector<8x128xf32>
    %288 = arith.select %15, %282, %287 : vector<8x128xi1>, vector<8x128xf32>
    %c96_i32_88 = arith.constant 96 : i32
    %289 = tpu.dynamic_rotate %288 by %c96_i32_88 dim 1 : vector<8x128xf32>, i32 -> vector<8x128xf32>
    %c64_i32_89 = arith.constant 64 : i32
    %290 = tpu.dynamic_rotate %288 by %c64_i32_89 dim 1 : vector<8x128xf32>, i32 -> vector<8x128xf32>
    %c32_i32_90 = arith.constant 32 : i32
    %291 = tpu.dynamic_rotate %288 by %c32_i32_90 dim 1 : vector<8x128xf32>, i32 -> vector<8x128xf32>
    %292 = arith.mulf %289, %254 : vector<8x128xf32>
    %293 = arith.mulf %288, %290 : vector<8x128xf32>
    %294 = arith.addf %292, %293 : vector<8x128xf32>
    %295 = math.tanh %294 : vector<8x128xf32>
    %296 = arith.mulf %291, %295 : vector<8x128xf32>
    %c56 = arith.constant 56 : index
    %c0_91 = arith.constant 0 : index
    %297 = vector.load %arg8[%c56, %c0_91] : memref<64x128xf32, #tpu.memory_space<vmem>>, vector<8x128xf32>
    %298 = arith.truncf %275 : vector<8x128xf32> to vector<8x128xbf16>
    %cst_92 = arith.constant dense<0.000000e+00> : vector<8x128xf32>
    %299 = tpu.matmul %298, %7, %cst_92 {dimension_numbers = #tpu.dot_dimension_numbers<[1], [0], [0], [1], [0, 0, 1, 1], [], []>} : vector<8x128xbf16>, vector<128x128xbf16>, vector<8x128xf32> -> vector<8x128xf32>
    %300 = arith.addf %297, %299 : vector<8x128xf32>
    %301 = math.tanh %300 : vector<8x128xf32>
    %302 = arith.negf %300 : vector<8x128xf32>
    %303 = math.exp %302 : vector<8x128xf32>
    %cst_93 = arith.constant 1.000000e+00 : f32
    %304 = vector.broadcast %cst_93 : f32 to vector<8x128xf32>
    %305 = arith.addf %304, %303 : vector<8x128xf32>
    %306 = arith.divf %304, %305 : vector<8x128xf32>
    %307 = arith.select %15, %301, %306 : vector<8x128xi1>, vector<8x128xf32>
    %c96_i32_94 = arith.constant 96 : i32
    %308 = tpu.dynamic_rotate %307 by %c96_i32_94 dim 1 : vector<8x128xf32>, i32 -> vector<8x128xf32>
    %c64_i32_95 = arith.constant 64 : i32
    %309 = tpu.dynamic_rotate %307 by %c64_i32_95 dim 1 : vector<8x128xf32>, i32 -> vector<8x128xf32>
    %c32_i32_96 = arith.constant 32 : i32
    %310 = tpu.dynamic_rotate %307 by %c32_i32_96 dim 1 : vector<8x128xf32>, i32 -> vector<8x128xf32>
    %311 = arith.mulf %308, %273 : vector<8x128xf32>
    %312 = arith.mulf %307, %309 : vector<8x128xf32>
    %313 = arith.addf %311, %312 : vector<8x128xf32>
    %314 = math.tanh %313 : vector<8x128xf32>
    %315 = arith.mulf %310, %314 : vector<8x128xf32>
    %c0_97 = arith.constant 0 : index
    %c0_98 = arith.constant 0 : index
    %c0_99 = arith.constant 0 : index
    %316 = vector.load %arg6[%c0_97, %c0_98, %c0_99] : memref<2x8x128xf32, #tpu.memory_space<vmem>>, vector<1x8x128xf32>
    %317 = vector.shape_cast %316 : vector<1x8x128xf32> to vector<8x128xf32>
    %318 = vector.shape_cast %315 : vector<8x128xf32> to vector<1x8x128xf32>
    tpu.vector_store %arg6[%c0_97, %c0_98, %c0_99], %318 {strides = array<i32>} : memref<2x8x128xf32, #tpu.memory_space<vmem>>, vector<1x8x128xf32>,
    %c0_100 = arith.constant 0 : index
    %c0_101 = arith.constant 0 : index
    %c0_102 = arith.constant 0 : index
    %319 = vector.load %arg7[%c0_100, %c0_101, %c0_102] : memref<2x8x128xf32, #tpu.memory_space<vmem>>, vector<1x8x128xf32>
    %320 = vector.shape_cast %319 : vector<1x8x128xf32> to vector<8x128xf32>
    %321 = vector.shape_cast %313 : vector<8x128xf32> to vector<1x8x128xf32>
    tpu.vector_store %arg7[%c0_100, %c0_101, %c0_102], %321 {strides = array<i32>} : memref<2x8x128xf32, #tpu.memory_space<vmem>>, vector<1x8x128xf32>,
    %322 = arith.truncf %315 : vector<8x128xf32> to vector<8x128xbf16>
    %323 = arith.truncf %296 : vector<8x128xf32> to vector<8x128xbf16>
    %324 = tpu.concatenate %322, %323 in 1 : vector<8x128xbf16>, vector<8x128xbf16> -> vector<8x256xbf16>
    %cst_103 = arith.constant dense<0.000000e+00> : vector<8x128xf32>
    %325 = tpu.matmul %324, %8, %cst_103 {dimension_numbers = #tpu.dot_dimension_numbers<[1], [0], [0], [1], [0, 0, 1, 1], [], []>} : vector<8x256xbf16>, vector<256x128xbf16>, vector<8x128xf32> -> vector<8x128xf32>
    %326 = vector.broadcast %9 : vector<1x128xf32> to vector<8x128xf32>
    %327 = arith.addf %325, %326 : vector<8x128xf32>
    %328 = math.tanh %327 : vector<8x128xf32>
    %329 = arith.negf %327 : vector<8x128xf32>
    %330 = math.exp %329 : vector<8x128xf32>
    %cst_104 = arith.constant 1.000000e+00 : f32
    %331 = vector.broadcast %cst_104 : f32 to vector<8x128xf32>
    %332 = arith.addf %331, %330 : vector<8x128xf32>
    %333 = arith.divf %331, %332 : vector<8x128xf32>
    %334 = arith.select %15, %328, %333 : vector<8x128xi1>, vector<8x128xf32>
    %c96_i32_105 = arith.constant 96 : i32
    %335 = tpu.dynamic_rotate %334 by %c96_i32_105 dim 1 : vector<8x128xf32>, i32 -> vector<8x128xf32>
    %c64_i32_106 = arith.constant 64 : i32
    %336 = tpu.dynamic_rotate %334 by %c64_i32_106 dim 1 : vector<8x128xf32>, i32 -> vector<8x128xf32>
    %c32_i32_107 = arith.constant 32 : i32
    %337 = tpu.dynamic_rotate %334 by %c32_i32_107 dim 1 : vector<8x128xf32>, i32 -> vector<8x128xf32>
    %338 = arith.mulf %335, %294 : vector<8x128xf32>
    %339 = arith.mulf %334, %336 : vector<8x128xf32>
    %340 = arith.addf %338, %339 : vector<8x128xf32>
    %341 = math.tanh %340 : vector<8x128xf32>
    %342 = arith.mulf %337, %341 : vector<8x128xf32>
    %c1 = arith.constant 1 : index
    %c0_108 = arith.constant 0 : index
    %c0_109 = arith.constant 0 : index
    %343 = vector.load %arg6[%c1, %c0_108, %c0_109] : memref<2x8x128xf32, #tpu.memory_space<vmem>>, vector<1x8x128xf32>
    %344 = vector.shape_cast %343 : vector<1x8x128xf32> to vector<8x128xf32>
    %345 = vector.shape_cast %342 : vector<8x128xf32> to vector<1x8x128xf32>
    tpu.vector_store %arg6[%c1, %c0_108, %c0_109], %345 {strides = array<i32>} : memref<2x8x128xf32, #tpu.memory_space<vmem>>, vector<1x8x128xf32>,
    %c1_110 = arith.constant 1 : index
    %c0_111 = arith.constant 0 : index
    %c0_112 = arith.constant 0 : index
    %346 = vector.load %arg7[%c1_110, %c0_111, %c0_112] : memref<2x8x128xf32, #tpu.memory_space<vmem>>, vector<1x8x128xf32>
    %347 = vector.shape_cast %346 : vector<1x8x128xf32> to vector<8x128xf32>
    %348 = vector.shape_cast %340 : vector<8x128xf32> to vector<1x8x128xf32>
    tpu.vector_store %arg7[%c1_110, %c0_111, %c0_112], %348 {strides = array<i32>} : memref<2x8x128xf32, #tpu.memory_space<vmem>>, vector<1x8x128xf32>,
    return
  }
}

</mosaic_0001>

<bundles_post_ra>
// kernel: encoder_forward.1
= control target key start
LH: loop header
LB: loop body
LE: loop exit
PB: predicated region body
PF: predicated region fallthrough
CT: control target
= control target key end

     0   :  { %v2013_v0 = vmov 0.0   ;;  %vm2014_vm0 = vmmov 0   ;;  %vm69_vm1 = vcmask 130048   ;;  %v2015_v12 = vmov 0   ;;  %s2016_s8 = smov 32   ;;  %s2017_s9 = smov 96   ;;  %s2793_s2 = inlined_call_operand.vmem [shape: bf16[128,128], index: 2, kind: input, shape index: {}]   ;;  %s2794_s1 = inlined_call_operand.vmem [shape: bf16[16,128], index: 1, kind: input, shape index: {}]   ;;  %s2795_s0 = inlined_call_operand.vmem [shape: bf16[64,16], index: 0, kind: input, shape index: {}]   ;;  %s2796_s4 = inlined_call_operand.vmem [shape: bf16[256,128], index: 4, kind: input, shape index: {}]   ;;  %s2797_s3 = inlined_call_operand.vmem [shape: f32[1,128], index: 3, kind: input, shape index: {}]   ;;  %s2798_s5 = inlined_call_operand.vmem [shape: f32[1,128], index: 5, kind: input, shape index: {}]   ;;  %s2799_s7 = inlined_call_operand.vmem [shape: f32[2,8,128], index: 7, kind: output, shape index: {1}]   ;;  %s2800_s6 = inlined_call_operand.vmem [shape: f32[2,8,128], index: 6, kind: output, shape index: {0}]  }
   0x1   :  { %1664 = vmatprep.subr.bf16.mxu1 %v2013_v0  ;;  %v2063_v1 = vld [vmem:[%s2793_s2] sm:$0xff]   ;;  %1680 = vmatprep.mubr.msk.bf16.mxu1 %vm2014_vm0, %v2013_v0  ;;  %v2071_v2 = vld [vmem:[%s2793_s2 + $0x8] sm:$0xff]   ;;  %v2077_v3 = vld [vmem:[%s2793_s2 + $0x10] sm:$0xff]   ;;  %v204_v31 = vlaneseq  ;;  %s2018_s14 = smov 64  }
   0x2   :  { %1665 = vmatpush3.bf16.msra.mxu1 %v2063_v1  ;;  %v1836_v4 = vld [vmem:[%s2794_s1] sm:$0xff]   ;;  %v1839_v6 = vld [vmem:[%s2795_s0 + $0x8] sm:$0xff]   ;;  %v2095_v7 = vld [vmem:[%s2793_s2 + $0x18] sm:$0xff]  }
   0x3   :  { %1666 = vmatprep.subr.bf16.mxu1 %v2013_v0  ;;  %v1837_v5 = vld [vmem:[%s2795_s0] sm:$0xff]   ;;  %1654 = vmatprep.subr.bf16.mxu0 %v1836_v4  ;;  %v2110_v9 = vld [vmem:[%s2793_s2 + $0x28] sm:$0xff]   ;;  %v2117_v10 = vld [vmem:[%s2793_s2 + $0x30] sm:$0xff]   ;;  %v205_v35 = vand.u32 127, %v204_v31 }
   0x4   :  { %1655 = vmatpush3.bf16.msra.mxu0 %v1836_v4  ;;  %1656 = vmatprep.mubr.msk.bf16.mxu0 %vm69_vm1, %v1837_v5  ;;  %v2103_v8 = vld [vmem:[%s2793_s2 + $0x20] sm:$0xff]   ;;  %v2124_v11 = vld [vmem:[%s2793_s2 + $0x38] sm:$0xff]   ;;  %v2162_v15 = vld [vmem:[%s2796_s4 + $0x48] sm:$0xff]  }
   0x5   :  { %v2151_v13 = vld [vmem:[%s2796_s4 + $0x40] sm:$0xff]   ;;  %v2168_v16 = vld [vmem:[%s2796_s4 + $0x8] sm:$0xff]   ;;  %v2174_v17 = vld [vmem:[%s2796_s4 + $0x50] sm:$0xff]   ;;  %vm206_vm2 = vcmp.ge.s32.totalorder %v205_v35, 64  ;;  %vm207_vm3 = vcmp.lt.s32.totalorder %v205_v35, 96 }
   0x6   :  { %1667 = vmatpush3.bf16.msra.mxu1 %v2071_v2  ;;  %v2156_v14 = vld [vmem:[%s2796_s4] sm:$0xff]   ;;  %1415 = vmatprep.subr.bf16.mxu0 %v2151_v13  ;;  %v2193_v32 = vld [vmem:[%s2796_s4 + $0x10] sm:$0xff]   ;;  %v2199_v34 = vld [vmem:[%s2796_s4 + $0x58] sm:$0xff]  }
   0x7   :  { %1668 = vmatprep.subr.bf16.mxu1 %v2013_v0  ;;  %1657 = vmatmul.mubr.msk.bf16.vlgmr.msra.gmra.mrb[0].mxu0 %vm69_vm1, %v1839_v6  ;;  %v2187_v22 = vld [vmem:[%s2797_s3] ss:$0 sm:$0xff]  ;;  %v2205_v36 = vld [vmem:[%s2796_s4 + $0x18] sm:$0xff]   ;;  %v1851_v39 = vld [vmem:[%s2795_s0 + $0x10] sm:$0xff]  }
   0x8   :  { %1416 = vmatpush3.bf16.msra.mxu0 %v2156_v14  ;;  %v2211_v37 = vld [vmem:[%s2796_s4 + $0x60] sm:$0xff]   ;;  %v2226_v40 = vld [vmem:[%s2796_s4 + $0x68] sm:$0xff]   ;;  %v1853_v41 = vld [vmem:[%s2795_s0 + $0x18] sm:$0xff]   ;;  %1660 = vmatprep.mubr.msk.bf16.mxu0 %vm69_vm1, %v1851_v39 }
   0x9   :  { %1417 = vmatprep.subr.bf16.mxu0 %v2162_v15  ;;  %v2216_v38 = vld [vmem:[%s2796_s4 + $0x20] sm:$0xff]   ;;  %vm2231_vm4 = vmand %vm206_vm2, %vm207_vm3  ;;  %v2238_v43 = vld [vmem:[%s2796_s4 + $0x28] sm:$0xff]  }
   0xa   :  { %1669 = vmatpush3.bf16.msra.mxu1 %v2077_v3  ;;  %v2245_v45 = vld [vmem:[%s2796_s4 + $0x70] sm:$0xff]   ;;  %v2262_v49 = vld [vmem:[%s2796_s4 + $0x78] sm:$0xff]  }
   0xb   :  { %1670 = vmatprep.subr.bf16.mxu1 %v2013_v0  ;;  %v2254_v48 = vld [vmem:[%s2796_s4 + $0x30] sm:$0xff]   ;;  %v2269_v50 = vld [vmem:[%s2796_s4 + $0x38] sm:$0xff]  }
   0xc   :  { %1418 = vmatpush3.bf16.msra.mxu0 %v2168_v16 }
   0xd   :  { %1419 = vmatprep.subr.bf16.mxu0 %v2174_v17 }
   0xe   :  { %1671 = vmatpush3.bf16.msra.mxu1 %v2095_v7 }
   0xf   :  { %1672 = vmatprep.subr.bf16.mxu1 %v2013_v0  ;;  %1661 = vmatmul.mubr.msk.bf16.gmra.mrb[4].mxu0 %vm69_vm1, %v1853_v41 }
  0x10   :  { %1420 = vmatpush3.bf16.msra.mxu0 %v2193_v32  ;;  %453 = vmatprep.mubr.bf16.mxu0 %v2015_v12 }
  0x11   :  { %1421 = vmatprep.subr.bf16.mxu0 %v2199_v34 }
  0x12   :  { %1673 = vmatpush3.bf16.msra.mxu1 %v2103_v8 }
  0x13   :  { %1674 = vmatprep.subr.bf16.mxu1 %v2013_v0 }
  0x14   :  { %1422 = vmatpush3.bf16.msra.mxu0 %v2205_v36 }
  0x15   :  { %1423 = vmatprep.subr.bf16.mxu0 %v2211_v37 }
  0x16   :  { %1675 = vmatpush3.bf16.msra.mxu1 %v2110_v9 }
  0x17   :  { %1676 = vmatprep.subr.bf16.mxu1 %v2013_v0 }
  0x18   :  { %1424 = vmatpush3.bf16.msra.mxu0 %v2216_v38 }
  0x19   :  { %1425 = vmatprep.subr.bf16.mxu0 %v2226_v40 }
  0x1a   :  { %1677 = vmatpush3.bf16.msra.mxu1 %v2117_v10 }
  0x1b   :  { %1678 = vmatprep.subr.bf16.mxu1 %v2013_v0 }
  0x1c   :  { %1426 = vmatpush3.bf16.msra.mxu0 %v2238_v43 }
  0x1d   :  { %1427 = vmatprep.subr.bf16.mxu0 %v2245_v45 }
  0x1e   :  { %1679 = vmatpush3.bf16.msra.mxu1 %v2124_v11 }
  0x1f   :  { %1684 = vmatprep.subr.bf16.mxu1 %v2013_v0 }
  0x20   :  { %1428 = vmatpush3.bf16.msra.mxu0 %v2254_v48 }
  0x21   :  { %1681 = vmatmul.mubr.bf16.vlgmr.msra.gmra.mrb[0].mxu1 %v2015_v12  ;;  %1429 = vmatprep.subr.bf16.mxu0 %v2262_v49 }
  0x22   :  { %1685 = vmatpush3.bf16.msra.mxu1 %v2063_v1  ;;  %1700 = vmatprep.mubr.msk.bf16.mxu1 %vm2014_vm0, %v2013_v0 }
  0x23   :  { %1686 = vmatprep.subr.bf16.mxu1 %v2013_v0 }
  0x24   :  { %1430 = vmatpush3.bf16.msra.mxu0 %v2269_v50 }
  0x25   :  { %1446 = vmatprep.subr.bf16.mxu0 %v2151_v13 }
  0x26   :  { %1687 = vmatpush3.bf16.msra.mxu1 %v2071_v2 }
  0x27   :  { %1688 = vmatprep.subr.bf16.mxu1 %v2013_v0 }
  0x2a   :  { %1689 = vmatpush3.bf16.msra.mxu1 %v2077_v3 }
  0x2b   :  { %1690 = vmatprep.subr.bf16.mxu1 %v2013_v0 }
  0x2e   :  { %1691 = vmatpush3.bf16.msra.mxu1 %v2095_v7 }
  0x2f   :  { %1692 = vmatprep.subr.bf16.mxu1 %v2013_v0 }
  0x32   :  { %1693 = vmatpush3.bf16.msra.mxu1 %v2103_v8 }
  0x33   :  { %1694 = vmatprep.subr.bf16.mxu1 %v2013_v0 }
  0x36   :  { %1695 = vmatpush3.bf16.msra.mxu1 %v2110_v9 }
  0x37   :  { %1696 = vmatprep.subr.bf16.mxu1 %v2013_v0 }
  0x3a   :  { %1697 = vmatpush3.bf16.msra.mxu1 %v2117_v10 }
  0x3b   :  { %1698 = vmatprep.subr.bf16.mxu1 %v2013_v0 }
  0x3e   :  { %1699 = vmatpush3.bf16.msra.mxu1 %v2124_v11 }
  0x3f   :  { %1704 = vmatprep.subr.bf16.mxu1 %v2013_v0 }
  0xda   :  { %v2178_v18 = vpop.f32.mrb[0].mxu0 }
  0xdb   :  { %v116_v19 = vpop.f32.mrb[1].mxu0 }
  0xdc   :  { %v2180_v20 = vpop.f32.mrb[2].mxu0  ;;  %v117_v23 = vadd.f32 %v2187_v22, %v116_v19  ;;  %v2325_v19 = vld [vmem:[%s2798_s5] ss:$0 sm:$0xff] }
  0xdd   :  { %v2182_v21 = vpop.f32.mrb[3].mxu0 }
  0xde   :  { %v120_v4 = vadd.f32 %v2187_v22, %v2182_v21 }
  0xe2   :  { %v2312_v60 = vpop.f32.mrb[4].mxu0 }
  0xe3   :  { %v2314_v61 = vpop.f32.mrb[5].mxu0 }
  0xe4   :  { %v2316_v62 = vpop.f32.mrb[6].mxu0 }
  0xe5   :  { %v2318_v63 = vpop.f32.mrb[7].mxu0 }
  0xf4   :  { %v292_v24 = vpop.f32.mrb[0].mxu1 }
  0xf5   :  { %v298_v25 = vadd.f32 %v292_v24, %v117_v23  ;;  %v1682_v26 = vpop.f32.mrb[1].mxu1 }
  0xf6   :  { %v295_v27 = vpop.f32.mrb[2].mxu1 }
  0xf7   :  { %v1366_v28 = vmul.f32 -1.442695, %v298_v25  ;;  %v1683_v29 = vpop.f32.mrb[3].mxu1 }
  0xf9   :  { %1859 = vpow2.f32 %v1366_v28 }
  0xfa   :  { %1861 = vtanh.f32 %v298_v25 }
 0x103   :  { %v1860_v30 = vpop.eup %1859 }
 0x104   :  { %v303_v33 = vadd.f32 1.0, %v1860_v30  ;;  %v1862_v44 = vpop.eup %1861 }
 0x106   :  { %1863 = vrcp.f32 %v303_v33 }
 0x110   :  { %v1864_v46 = vpop.eup %1863 }
 0x111   :  { %v306_v47 = vsel %vm2231_vm4, %v1862_v44, %v1864_v46 }
 0x112   :  { %311 = vrot.lane.b32.xlu1 %v306_v47, %s2016_s8  ;;  %307 = vrot.lane.b32.xlu0 %v306_v47, %s2017_s9 }
 0x116   :  { %309 = vrot.lane.b32.xlu0 %v306_v47, %s2018_s14 }
 0x184   :  { %v308_v51 = vpop.permute.xlu0 %307  ;;  %v312_v57 = vpop.permute.xlu1 %311 }
 0x185   :  { %v313_v53 = vmul.f32 0.0, %v308_v51 }
 0x188   :  { %v310_v52 = vpop.permute.xlu0 %309 }
 0x189   :  { %v314_v54 = vmul.f32 %v310_v52, %v306_v47 }
 0x18b   :  { %v2275_v55 = vadd.f32 %v314_v54, %v313_v53 }
 0x18d   :  { %1865 = vtanh.f32 %v2275_v55 }
 0x197   :  { %v1866_v56 = vpop.eup %1865 }
 0x198   :  { %v317_v58 = vmul.f32 %v1866_v56, %v312_v57 }
 0x19a   :  { %v318_v59 = vpack.c.bf16 %v317_v58, %v317_v58 }
 0x19c   :  { %454 = vmatmul.mubr.bf16.vlgmr.msra.gmra.mrb[8].mxu0 %v318_v59  ;;  %1701 = vmatmul.mubr.bf16.vlgmr.msra.gmra.mrb[4].mxu1 %v318_v59 }
 0x19d   :  { %1447 = vmatpush3.bf16.msra.mxu0 %v2156_v14  ;;  %1705 = vmatpush3.bf16.msra.mxu1 %v2063_v1 }
 0x19e   :  { %1448 = vmatprep.subr.bf16.mxu0 %v2162_v15  ;;  %1706 = vmatprep.subr.bf16.mxu1 %v2013_v0 }
 0x19f   :  { %1720 = vmatprep.mubr.msk.bf16.mxu1 %vm2014_vm0, %v2013_v0 }
 0x1a1   :  { %1449 = vmatpush3.bf16.msra.mxu0 %v2168_v16  ;;  %1707 = vmatpush3.bf16.msra.mxu1 %v2071_v2 }
 0x1a2   :  { %1450 = vmatprep.subr.bf16.mxu0 %v2174_v17  ;;  %1708 = vmatprep.subr.bf16.mxu1 %v2013_v0 }
 0x1a5   :  { %1451 = vmatpush3.bf16.msra.mxu0 %v2193_v32  ;;  %1709 = vmatpush3.bf16.msra.mxu1 %v2077_v3 }
 0x1a6   :  { %1452 = vmatprep.subr.bf16.mxu0 %v2199_v34  ;;  %1710 = vmatprep.subr.bf16.mxu1 %v2013_v0 }
 0x1a9   :  { %1453 = vmatpush3.bf16.msra.mxu0 %v2205_v36  ;;  %1711 = vmatpush3.bf16.msra.mxu1 %v2095_v7 }
 0x1aa   :  { %1454 = vmatprep.subr.bf16.mxu0 %v2211_v37  ;;  %1712 = vmatprep.subr.bf16.mxu1 %v2013_v0 }
 0x1ad   :  { %1455 = vmatpush3.bf16.msra.mxu0 %v2216_v38  ;;  %1713 = vmatpush3.bf16.msra.mxu1 %v2103_v8 }
 0x1ae   :  { %1456 = vmatprep.subr.bf16.mxu0 %v2226_v40  ;;  %1714 = vmatprep.subr.bf16.mxu1 %v2013_v0 }
 0x1b1   :  { %1457 = vmatpush3.bf16.msra.mxu0 %v2238_v43  ;;  %1715 = vmatpush3.bf16.msra.mxu1 %v2110_v9 }
 0x1b2   :  { %1458 = vmatprep.subr.bf16.mxu0 %v2245_v45  ;;  %1716 = vmatprep.subr.bf16.mxu1 %v2013_v0 }
 0x1b5   :  { %1459 = vmatpush3.bf16.msra.mxu0 %v2254_v48  ;;  %1717 = vmatpush3.bf16.msra.mxu1 %v2117_v10 }
 0x1b6   :  { %1460 = vmatprep.subr.bf16.mxu0 %v2262_v49  ;;  %1718 = vmatprep.subr.bf16.mxu1 %v2013_v0 }
 0x1b9   :  { %1461 = vmatpush3.bf16.msra.mxu0 %v2269_v50  ;;  %1719 = vmatpush3.bf16.msra.mxu1 %v2124_v11 }
 0x1ba   :  { %1477 = vmatprep.subr.bf16.mxu0 %v2151_v13  ;;  %1724 = vmatprep.subr.bf16.mxu1 %v2013_v0 }
 0x26f   :  { %v1431_v5 = vpop.f32.mrb[8].mxu0  ;;  %v515_v6 = vpop.f32.mrb[4].mxu1 }
 0x270   :  { %v521_v12 = vadd.f32 %v515_v6, %v120_v4  ;;  %v1432_v23 = vpop.f32.mrb[9].mxu0  ;;  %v1702_v24 = vpop.f32.mrb[5].mxu1 }
 0x271   :  { %v1433_v25 = vadd.f32 %v1432_v23, %v1431_v5  ;;  %v1434_v26 = vpop.f32.mrb[10].mxu0  ;;  %v518_v27 = vpop.f32.mrb[6].mxu1 }
 0x272   :  { %v1385_v28 = vmul.f32 -1.442695, %v521_v12  ;;  %v1435_v29 = vpop.f32.mrb[11].mxu0  ;;  %v1703_v30 = vpop.f32.mrb[7].mxu1 }
 0x273   :  { %v456_v31 = vadd.f32 %v1433_v25, %v2325_v19 }
 0x274   :  { %1867 = vpow2.f32 %v1385_v28 }
 0x275   :  { %v1384_v21 = vmul.f32 -1.442695, %v456_v31 }
 0x277   :  { %1869 = vpow2.f32 %v1384_v21 }
 0x278   :  { %1871 = vtanh.f32 %v456_v31 }
 0x27e   :  { %v1868_v33 = vpop.eup %1867 }
 0x27f   :  { %v526_v39 = vadd.f32 1.0, %v1868_v33 }
 0x281   :  { %v1870_v35 = vpop.eup %1869 }
 0x282   :  { %v465_v41 = vadd.f32 1.0, %v1870_v35  ;;  %v1872_v44 = vpop.eup %1871 }
 0x284   :  { %1873 = vrcp.f32 %v465_v41 }
 0x285   :  { %1875 = vrcp.f32 %v526_v39 }
 0x286   :  { %1877 = vtanh.f32 %v521_v12 }
 0x28e   :  { %v1874_v46 = vpop.eup %1873 }
 0x28f   :  { %v468_v47 = vsel %vm2231_vm4, %v1872_v44, %v1874_v46  ;;  %v1876_v51 = vpop.eup %1875 }
 0x290   :  { %471 = vrot.lane.b32.xlu0 %v468_v47, %s2018_s14  ;;  %469 = vrot.lane.b32.xlu1 %v468_v47, %s2017_s9  ;;  %v1878_v52 = vpop.eup %1877 }
 0x291   :  { %v529_v53 = vsel %vm2231_vm4, %v1878_v52, %v1876_v51 }
 0x294   :  { %532 = vrot.lane.b32.xlu0 %v529_v53, %s2018_s14  ;;  %530 = vrot.lane.b32.xlu1 %v529_v53, %s2017_s9 }
 0x298   :  { %534 = vrot.lane.b32.xlu0 %v529_v53, %s2016_s8  ;;  %473 = vrot.lane.b32.xlu1 %v468_v47, %s2016_s8 }
 0x302   :  { %v472_v54 = vpop.permute.xlu0 %471  ;;  %v470_v56 = vpop.permute.xlu1 %469 }
 0x303   :  { %v476_v57 = vmul.f32 %v472_v54, %v468_v47  ;;  %v475_v58 = vmul.f32 0.0, %v470_v56 }
 0x305   :  { %v2338_v59 = vadd.f32 %v476_v57, %v475_v58 }
 0x306   :  { %v533_v4 = vpop.permute.xlu0 %532  ;;  %v531_v5 = vpop.permute.xlu1 %530 }
 0x307   :  { %1879 = vtanh.f32 %v2338_v59  ;;  %v537_v6 = vmul.f32 %v533_v4, %v529_v53  ;;  %v536_v12 = vmul.f32 %v531_v5, %v2275_v55  ;;  %v125_v55 = vadd.f32 %v2178_v18, %v2187_v22 }
 0x309   :  { %v2342_v23 = vadd.f32 %v537_v6, %v536_v12 }
 0x30a   :  { %v474_v25 = vpop.permute.xlu1 %473  ;;  %v535_v29 = vpop.permute.xlu0 %534 }
 0x30b   :  { %1881 = vtanh.f32 %v2342_v23 }
 0x311   :  { %v1880_v24 = vpop.eup %1879 }
 0x312   :  { %v479_v26 = vmul.f32 %v1880_v24, %v474_v25 }
 0x314   :  { %v542_v27 = vpack.c.bf16 %v479_v26, %v479_v26 }
 0x315   :  { %v1882_v28 = vpop.eup %1881 }
 0x316   :  { %v540_v30 = vmul.f32 %v1882_v28, %v535_v29  ;;  %575 = vmatprep.mubr.bf16.mxu0 %v542_v27 }
 0x318   :  { %v541_v31 = vpack.c.bf16 %v540_v30, %v540_v30 }
 0x31a   :  { %576 = vmatmul.mubr.bf16.vlgmr.msra.gmra.mrb[12].mxu0 %v541_v31  ;;  %1721 = vmatmul.mubr.bf16.vlgmr.msra.gmra.mrb[8].mxu1 %v541_v31 }
 0x31b   :  { %1478 = vmatpush3.bf16.msra.mxu0 %v2156_v14  ;;  %1725 = vmatpush3.bf16.msra.mxu1 %v2063_v1 }
 0x31c   :  { %1479 = vmatprep.subr.bf16.mxu0 %v2162_v15  ;;  %1726 = vmatprep.subr.bf16.mxu1 %v2013_v0 }
 0x31d   :  { %1740 = vmatprep.mubr.msk.bf16.mxu1 %vm2014_vm0, %v2013_v0 }
 0x31f   :  { %1480 = vmatpush3.bf16.msra.mxu0 %v2168_v16  ;;  %1727 = vmatpush3.bf16.msra.mxu1 %v2071_v2 }
 0x320   :  { %1481 = vmatprep.subr.bf16.mxu0 %v2174_v17  ;;  %1728 = vmatprep.subr.bf16.mxu1 %v2013_v0 }
 0x323   :  { %1482 = vmatpush3.bf16.msra.mxu0 %v2193_v32  ;;  %1729 = vmatpush3.bf16.msra.mxu1 %v2077_v3 }
 0x324   :  { %1483 = vmatprep.subr.bf16.mxu0 %v2199_v34  ;;  %1730 = vmatprep.subr.bf16.mxu1 %v2013_v0 }
 0x327   :  { %1484 = vmatpush3.bf16.msra.mxu0 %v2205_v36  ;;  %1731 = vmatpush3.bf16.msra.mxu1 %v2095_v7 }
 0x328   :  { %1485 = vmatprep.subr.bf16.mxu0 %v2211_v37  ;;  %1732 = vmatprep.subr.bf16.mxu1 %v2013_v0 }
 0x32b   :  { %1486 = vmatpush3.bf16.msra.mxu0 %v2216_v38  ;;  %1733 = vmatpush3.bf16.msra.mxu1 %v2103_v8 }
 0x32c   :  { %1487 = vmatprep.subr.bf16.mxu0 %v2226_v40  ;;  %1734 = vmatprep.subr.bf16.mxu1 %v2013_v0 }
 0x32f   :  { %1488 = vmatpush3.bf16.msra.mxu0 %v2238_v43  ;;  %1735 = vmatpush3.bf16.msra.mxu1 %v2110_v9 }
 0x330   :  { %1489 = vmatprep.subr.bf16.mxu0 %v2245_v45  ;;  %1736 = vmatprep.subr.bf16.mxu1 %v2013_v0 }
 0x333   :  { %1490 = vmatpush3.bf16.msra.mxu0 %v2254_v48  ;;  %1737 = vmatpush3.bf16.msra.mxu1 %v2117_v10 }
 0x334   :  { %1491 = vmatprep.subr.bf16.mxu0 %v2262_v49  ;;  %1738 = vmatprep.subr.bf16.mxu1 %v2013_v0 }
 0x337   :  { %1492 = vmatpush3.bf16.msra.mxu0 %v2269_v50  ;;  %1739 = vmatpush3.bf16.msra.mxu1 %v2124_v11 }
 0x338   :  { %1508 = vmatprep.subr.bf16.mxu0 %v2151_v13  ;;  %1744 = vmatprep.subr.bf16.mxu1 %v2013_v0 }
 0x3ed   :  { %v1462_v21 = vpop.f32.mrb[12].mxu0  ;;  %v637_v33 = vpop.f32.mrb[8].mxu1 }
 0x3ee   :  { %v643_v35 = vadd.f32 %v637_v33, %v125_v55  ;;  %v1463_v39 = vpop.f32.mrb[13].mxu0  ;;  %v1722_v41 = vpop.f32.mrb[9].mxu1 }
 0x3ef   :  { %v1464_v44 = vadd.f32 %v1463_v39, %v1462_v21  ;;  %v1465_v46 = vpop.f32.mrb[14].mxu0  ;;  %v640_v47 = vpop.f32.mrb[10].mxu1 }
 0x3f0   :  { %v1387_v51 = vmul.f32 -1.442695, %v643_v35  ;;  %v1466_v52 = vpop.f32.mrb[15].mxu0  ;;  %v1723_v53 = vpop.f32.mrb[11].mxu1 }
 0x3f1   :  { %v578_v54 = vadd.f32 %v1464_v44, %v2325_v19 }
 0x3f2   :  { %1883 = vpow2.f32 %v1387_v51 }
 0x3f3   :  { %v1386_v56 = vmul.f32 -1.442695, %v578_v54 }
 0x3f5   :  { %1885 = vpow2.f32 %v1386_v56 }
 0x3f6   :  { %1887 = vtanh.f32 %v578_v54 }
 0x3fc   :  { %v1884_v57 = vpop.eup %1883 }
 0x3fd   :  { %v648_v4 = vadd.f32 1.0, %v1884_v57 }
 0x3ff   :  { %v1886_v58 = vpop.eup %1885 }
 0x400   :  { %v587_v18 = vadd.f32 1.0, %v1886_v58  ;;  %v1888_v5 = vpop.eup %1887 }
 0x402   :  { %1889 = vrcp.f32 %v587_v18 }
 0x403   :  { %1891 = vrcp.f32 %v648_v4 }
 0x404   :  { %1893 = vtanh.f32 %v643_v35 }
 0x40c   :  { %v1890_v6 = vpop.eup %1889 }
 0x40d   :  { %v590_v12 = vsel %vm2231_vm4, %v1888_v5, %v1890_v6  ;;  %v1892_v24 = vpop.eup %1891 }
 0x40e   :  { %593 = vrot.lane.b32.xlu0 %v590_v12, %s2018_s14  ;;  %591 = vrot.lane.b32.xlu1 %v590_v12, %s2017_s9  ;;  %v1894_v25 = vpop.eup %1893 }
 0x40f   :  { %v651_v26 = vsel %vm2231_vm4, %v1894_v25, %v1892_v24 }
 0x412   :  { %654 = vrot.lane.b32.xlu0 %v651_v26, %s2018_s14  ;;  %652 = vrot.lane.b32.xlu1 %v651_v26, %s2017_s9 }
 0x416   :  { %656 = vrot.lane.b32.xlu0 %v651_v26, %s2016_s8  ;;  %595 = vrot.lane.b32.xlu1 %v590_v12, %s2016_s8 }
 0x480   :  { %v594_v27 = vpop.permute.xlu0 %593  ;;  %v592_v28 = vpop.permute.xlu1 %591 }
 0x481   :  { %v598_v29 = vmul.f32 %v594_v27, %v590_v12  ;;  %v597_v30 = vmul.f32 %v592_v28, %v2338_v59 }
 0x483   :  { %v2393_v31 = vadd.f32 %v598_v29, %v597_v30 }
 0x484   :  { %v655_v55 = vpop.permute.xlu0 %654  ;;  %v653_v21 = vpop.permute.xlu1 %652 }
 0x485   :  { %1895 = vtanh.f32 %v2393_v31  ;;  %v659_v33 = vmul.f32 %v655_v55, %v651_v26  ;;  %v658_v35 = vmul.f32 %v653_v21, %v2342_v23  ;;  %v128_v23 = vadd.f32 %v2180_v20, %v2187_v22 }
 0x487   :  { %v2397_v39 = vadd.f32 %v659_v33, %v658_v35 }
 0x488   :  { %v596_v44 = vpop.permute.xlu1 %595  ;;  %v657_v52 = vpop.permute.xlu0 %656 }
 0x489   :  { %1897 = vtanh.f32 %v2397_v39 }
 0x48f   :  { %v1896_v41 = vpop.eup %1895 }
 0x490   :  { %v601_v46 = vmul.f32 %v1896_v41, %v596_v44 }
 0x492   :  { %v664_v47 = vpack.c.bf16 %v601_v46, %v601_v46 }
 0x493   :  { %v1898_v51 = vpop.eup %1897 }
 0x494   :  { %v662_v59 = vmul.f32 %v1898_v51, %v657_v52  ;;  %697 = vmatprep.mubr.bf16.mxu0 %v664_v47 }
 0x496   :  { %v663_v53 = vpack.c.bf16 %v662_v59, %v662_v59 }
 0x498   :  { %698 = vmatmul.mubr.bf16.vlgmr.msra.gmra.mrb[16].mxu0 %v663_v53  ;;  %1741 = vmatmul.mubr.bf16.vlgmr.msra.gmra.mrb[12].mxu1 %v663_v53 }
 0x499   :  { %1509 = vmatpush3.bf16.msra.mxu0 %v2156_v14  ;;  %1745 = vmatpush3.bf16.msra.mxu1 %v2063_v1 }
 0x49a   :  { %1510 = vmatprep.subr.bf16.mxu0 %v2162_v15  ;;  %1746 = vmatprep.subr.bf16.mxu1 %v2013_v0 }
 0x49b   :  { %1760 = vmatprep.mubr.msk.bf16.mxu1 %vm2014_vm0, %v2013_v0 }
 0x49d   :  { %1511 = vmatpush3.bf16.msra.mxu0 %v2168_v16  ;;  %1747 = vmatpush3.bf16.msra.mxu1 %v2071_v2 }
 0x49e   :  { %1512 = vmatprep.subr.bf16.mxu0 %v2174_v17  ;;  %1748 = vmatprep.subr.bf16.mxu1 %v2013_v0 }
 0x4a1   :  { %1513 = vmatpush3.bf16.msra.mxu0 %v2193_v32  ;;  %1749 = vmatpush3.bf16.msra.mxu1 %v2077_v3 }
 0x4a2   :  { %1514 = vmatprep.subr.bf16.mxu0 %v2199_v34  ;;  %1750 = vmatprep.subr.bf16.mxu1 %v2013_v0 }
 0x4a5   :  { %1515 = vmatpush3.bf16.msra.mxu0 %v2205_v36  ;;  %1751 = vmatpush3.bf16.msra.mxu1 %v2095_v7 }
 0x4a6   :  { %1516 = vmatprep.subr.bf16.mxu0 %v2211_v37  ;;  %1752 = vmatprep.subr.bf16.mxu1 %v2013_v0 }
 0x4a9   :  { %1517 = vmatpush3.bf16.msra.mxu0 %v2216_v38  ;;  %1753 = vmatpush3.bf16.msra.mxu1 %v2103_v8 }
 0x4aa   :  { %1518 = vmatprep.subr.bf16.mxu0 %v2226_v40  ;;  %1754 = vmatprep.subr.bf16.mxu1 %v2013_v0 }
 0x4ad   :  { %1519 = vmatpush3.bf16.msra.mxu0 %v2238_v43  ;;  %1755 = vmatpush3.bf16.msra.mxu1 %v2110_v9 }
 0x4ae   :  { %1520 = vmatprep.subr.bf16.mxu0 %v2245_v45  ;;  %1756 = vmatprep.subr.bf16.mxu1 %v2013_v0 }
 0x4b1   :  { %1521 = vmatpush3.bf16.msra.mxu0 %v2254_v48  ;;  %1757 = vmatpush3.bf16.msra.mxu1 %v2117_v10 }
 0x4b2   :  { %1522 = vmatprep.subr.bf16.mxu0 %v2262_v49  ;;  %1758 = vmatprep.subr.bf16.mxu1 %v2013_v0 }
 0x4b5   :  { %1523 = vmatpush3.bf16.msra.mxu0 %v2269_v50  ;;  %1759 = vmatpush3.bf16.msra.mxu1 %v2124_v11 }
 0x4b6   :  { %1539 = vmatprep.subr.bf16.mxu0 %v2151_v13  ;;  %1764 = vmatprep.subr.bf16.mxu1 %v2013_v0 }
 0x56b   :  { %v1493_v54 = vpop.f32.mrb[16].mxu0  ;;  %v759_v56 = vpop.f32.mrb[12].mxu1 }
 0x56c   :  { %v765_v57 = vadd.f32 %v759_v56, %v128_v23  ;;  %v1494_v58 = vpop.f32.mrb[17].mxu0  ;;  %v1742_v4 = vpop.f32.mrb[13].mxu1 }
 0x56d   :  { %v1495_v18 = vadd.f32 %v1494_v58, %v1493_v54  ;;  %v1496_v5 = vpop.f32.mrb[18].mxu0  ;;  %v762_v6 = vpop.f32.mrb[14].mxu1 }
 0x56e   :  { %v1389_v12 = vmul.f32 -1.442695, %v765_v57  ;;  %v1497_v24 = vpop.f32.mrb[19].mxu0  ;;  %v1743_v25 = vpop.f32.mrb[15].mxu1 }
 0x56f   :  { %v700_v26 = vadd.f32 %v1495_v18, %v2325_v19 }
 0x570   :  { %1899 = vpow2.f32 %v1389_v12 }
 0x571   :  { %v1388_v27 = vmul.f32 -1.442695, %v700_v26 }
 0x573   :  { %1901 = vpow2.f32 %v1388_v27 }
 0x574   :  { %1903 = vtanh.f32 %v700_v26 }
 0x57a   :  { %v1900_v28 = vpop.eup %1899 }
 0x57b   :  { %v770_v30 = vadd.f32 1.0, %v1900_v28 }
 0x57d   :  { %v1902_v29 = vpop.eup %1901 }
 0x57e   :  { %v709_v20 = vadd.f32 1.0, %v1902_v29  ;;  %v1904_v55 = vpop.eup %1903 }
 0x580   :  { %1905 = vrcp.f32 %v709_v20 }
 0x581   :  { %1907 = vrcp.f32 %v770_v30 }
 0x582   :  { %1909 = vtanh.f32 %v765_v57 }
 0x58a   :  { %v1906_v21 = vpop.eup %1905 }
 0x58b   :  { %v712_v33 = vsel %vm2231_vm4, %v1904_v55, %v1906_v21  ;;  %v1908_v35 = vpop.eup %1907 }
 0x58c   :  { %715 = vrot.lane.b32.xlu0 %v712_v33, %s2018_s14  ;;  %713 = vrot.lane.b32.xlu1 %v712_v33, %s2017_s9  ;;  %v1910_v41 = vpop.eup %1909 }
 0x58d   :  { %v773_v44 = vsel %vm2231_vm4, %v1910_v41, %v1908_v35 }
 0x590   :  { %776 = vrot.lane.b32.xlu0 %v773_v44, %s2018_s14  ;;  %774 = vrot.lane.b32.xlu1 %v773_v44, %s2017_s9 }
 0x594   :  { %778 = vrot.lane.b32.xlu0 %v773_v44, %s2016_s8  ;;  %717 = vrot.lane.b32.xlu1 %v712_v33, %s2016_s8 }
 0x5fe   :  { %v716_v46 = vpop.permute.xlu0 %715  ;;  %v714_v47 = vpop.permute.xlu1 %713 }
 0x5ff   :  { %v720_v51 = vmul.f32 %v716_v46, %v712_v33  ;;  %v719_v52 = vmul.f32 %v714_v47, %v2393_v31 }
 0x601   :  { %v2448_v59 = vadd.f32 %v720_v51, %v719_v52 }
 0x602   :  { %v777_v53 = vpop.permute.xlu0 %776  ;;  %v775_v23 = vpop.permute.xlu1 %774 }
 0x603   :  { %1911 = vtanh.f32 %v2448_v59  ;;  %v781_v54 = vmul.f32 %v777_v53, %v773_v44  ;;  %v780_v56 = vmul.f32 %v775_v23, %v2397_v39 }
 0x605   :  { %v2452_v57 = vadd.f32 %v781_v54, %v780_v56 }
 0x606   :  { %v718_v4 = vpop.permute.xlu1 %717  ;;  %v779_v12 = vpop.permute.xlu0 %778 }
 0x607   :  { %1913 = vtanh.f32 %v2452_v57 }
 0x60d   :  { %v1912_v58 = vpop.eup %1911 }
 0x60e   :  { %v723_v18 = vmul.f32 %v1912_v58, %v718_v4 }
 0x610   :  { %v786_v5 = vpack.c.bf16 %v723_v18, %v723_v18 }
 0x611   :  { %v1914_v6 = vpop.eup %1913 }
 0x612   :  { %v784_v31 = vmul.f32 %v1914_v6, %v779_v12  ;;  %819 = vmatprep.mubr.bf16.mxu0 %v786_v5 }
 0x614   :  { %v785_v24 = vpack.c.bf16 %v784_v31, %v784_v31 }
 0x616   :  { %820 = vmatmul.mubr.bf16.vlgmr.msra.gmra.mrb[20].mxu0 %v785_v24  ;;  %1761 = vmatmul.mubr.bf16.vlgmr.msra.gmra.mrb[16].mxu1 %v785_v24 }
 0x617   :  { %1540 = vmatpush3.bf16.msra.mxu0 %v2156_v14  ;;  %1765 = vmatpush3.bf16.msra.mxu1 %v2063_v1  ;;  %v133_v1 = vadd.f32 %v2187_v22, %v2314_v61 }
 0x618   :  { %1541 = vmatprep.subr.bf16.mxu0 %v2162_v15  ;;  %1766 = vmatprep.subr.bf16.mxu1 %v2013_v0 }
 0x619   :  { %1780 = vmatprep.mubr.msk.bf16.mxu1 %vm2014_vm0, %v2013_v0 }
 0x61b   :  { %1542 = vmatpush3.bf16.msra.mxu0 %v2168_v16  ;;  %1767 = vmatpush3.bf16.msra.mxu1 %v2071_v2 }
 0x61c   :  { %1543 = vmatprep.subr.bf16.mxu0 %v2174_v17  ;;  %1768 = vmatprep.subr.bf16.mxu1 %v2013_v0 }
 0x61f   :  { %1544 = vmatpush3.bf16.msra.mxu0 %v2193_v32  ;;  %1769 = vmatpush3.bf16.msra.mxu1 %v2077_v3 }
 0x620   :  { %1545 = vmatprep.subr.bf16.mxu0 %v2199_v34  ;;  %1770 = vmatprep.subr.bf16.mxu1 %v2013_v0 }
 0x623   :  { %1546 = vmatpush3.bf16.msra.mxu0 %v2205_v36  ;;  %1771 = vmatpush3.bf16.msra.mxu1 %v2095_v7 }
 0x624   :  { %1547 = vmatprep.subr.bf16.mxu0 %v2211_v37  ;;  %1772 = vmatprep.subr.bf16.mxu1 %v2013_v0 }
 0x627   :  { %1548 = vmatpush3.bf16.msra.mxu0 %v2216_v38  ;;  %1773 = vmatpush3.bf16.msra.mxu1 %v2103_v8 }
 0x628   :  { %1549 = vmatprep.subr.bf16.mxu0 %v2226_v40  ;;  %1774 = vmatprep.subr.bf16.mxu1 %v2013_v0 }
 0x62b   :  { %1550 = vmatpush3.bf16.msra.mxu0 %v2238_v43  ;;  %1775 = vmatpush3.bf16.msra.mxu1 %v2110_v9 }
 0x62c   :  { %1551 = vmatprep.subr.bf16.mxu0 %v2245_v45  ;;  %1776 = vmatprep.subr.bf16.mxu1 %v2013_v0 }
 0x62f   :  { %1552 = vmatpush3.bf16.msra.mxu0 %v2254_v48  ;;  %1777 = vmatpush3.bf16.msra.mxu1 %v2117_v10 }
 0x630   :  { %1553 = vmatprep.subr.bf16.mxu0 %v2262_v49  ;;  %1778 = vmatprep.subr.bf16.mxu1 %v2013_v0 }
 0x633   :  { %1554 = vmatpush3.bf16.msra.mxu0 %v2269_v50  ;;  %1779 = vmatpush3.bf16.msra.mxu1 %v2124_v11 }
 0x634   :  { %1570 = vmatprep.subr.bf16.mxu0 %v2151_v13  ;;  %1784 = vmatprep.subr.bf16.mxu1 %v2013_v0 }
 0x6e9   :  { %v1524_v2 = vpop.f32.mrb[20].mxu0  ;;  %v881_v3 = vpop.f32.mrb[16].mxu1 }
 0x6ea   :  { %v887_v7 = vadd.f32 %v881_v3, %v133_v1  ;;  %v1525_v8 = vpop.f32.mrb[21].mxu0  ;;  %v1762_v9 = vpop.f32.mrb[17].mxu1 }
 0x6eb   :  { %v1526_v10 = vadd.f32 %v1525_v8, %v1524_v2  ;;  %v1527_v39 = vpop.f32.mrb[22].mxu0  ;;  %v884_v25 = vpop.f32.mrb[18].mxu1 }
 0x6ec   :  { %v1391_v26 = vmul.f32 -1.442695, %v887_v7  ;;  %v1528_v27 = vpop.f32.mrb[23].mxu0  ;;  %v1763_v28 = vpop.f32.mrb[19].mxu1 }
 0x6ed   :  { %v822_v11 = vadd.f32 %v1526_v10, %v2325_v19 }
 0x6ee   :  { %1915 = vpow2.f32 %v1391_v26 }
 0x6ef   :  { %v1390_v13 = vmul.f32 -1.442695, %v822_v11 }
 0x6f1   :  { %1917 = vpow2.f32 %v1390_v13 }
 0x6f2   :  { %1919 = vtanh.f32 %v822_v11 }
 0x6f8   :  { %v1916_v29 = vpop.eup %1915 }
 0x6f9   :  { %v892_v20 = vadd.f32 1.0, %v1916_v29 }
 0x6fb   :  { %v1918_v30 = vpop.eup %1917 }
 0x6fc   :  { %v831_v61 = vadd.f32 1.0, %v1918_v30  ;;  %v1920_v55 = vpop.eup %1919 }
 0x6fe   :  { %1921 = vrcp.f32 %v831_v61 }
 0x6ff   :  { %1923 = vrcp.f32 %v892_v20 }
 0x700   :  { %1925 = vtanh.f32 %v887_v7 }
 0x708   :  { %v1922_v21 = vpop.eup %1921 }
 0x709   :  { %v834_v33 = vsel %vm2231_vm4, %v1920_v55, %v1922_v21  ;;  %v1924_v35 = vpop.eup %1923 }
 0x70a   :  { %837 = vrot.lane.b32.xlu0 %v834_v33, %s2018_s14  ;;  %835 = vrot.lane.b32.xlu1 %v834_v33, %s2017_s9  ;;  %v1926_v41 = vpop.eup %1925 }
 0x70b   :  { %v895_v44 = vsel %vm2231_vm4, %v1926_v41, %v1924_v35 }
 0x70e   :  { %898 = vrot.lane.b32.xlu0 %v895_v44, %s2018_s14  ;;  %896 = vrot.lane.b32.xlu1 %v895_v44, %s2017_s9 }
 0x712   :  { %900 = vrot.lane.b32.xlu0 %v895_v44, %s2016_s8  ;;  %839 = vrot.lane.b32.xlu1 %v834_v33, %s2016_s8 }
 0x77c   :  { %v838_v46 = vpop.permute.xlu0 %837  ;;  %v836_v47 = vpop.permute.xlu1 %835 }
 0x77d   :  { %v842_v51 = vmul.f32 %v838_v46, %v834_v33  ;;  %v841_v52 = vmul.f32 %v836_v47, %v2448_v59 }
 0x77f   :  { %v2503_v53 = vadd.f32 %v842_v51, %v841_v52 }
 0x780   :  { %v899_v23 = vpop.permute.xlu0 %898  ;;  %v897_v54 = vpop.permute.xlu1 %896 }
 0x781   :  { %1927 = vtanh.f32 %v2503_v53  ;;  %v903_v56 = vmul.f32 %v899_v23, %v895_v44  ;;  %v902_v58 = vmul.f32 %v897_v54, %v2452_v57  ;;  %v2514_v57 = vld [vmem:[%s2793_s2] sm:$0xff]  }
 0x783   :  { %v2507_v4 = vadd.f32 %v903_v56, %v902_v58 }
 0x784   :  { %v840_v5 = vpop.permute.xlu1 %839  ;;  %v901_v24 = vpop.permute.xlu0 %900 }
 0x785   :  { %1929 = vtanh.f32 %v2507_v4 }
 0x78b   :  { %v1928_v18 = vpop.eup %1927 }
 0x78c   :  { %v845_v6 = vmul.f32 %v1928_v18, %v840_v5  ;;  %v2613_v5 = vld [vmem:[%s2796_s4] sm:$0xff]  }
 0x78e   :  { %v908_v12 = vpack.c.bf16 %v845_v6, %v845_v6  ;;  %v2629_v6 = vld [vmem:[%s2796_s4 + $0x8] sm:$0xff]  }
 0x78f   :  { %v1930_v31 = vpop.eup %1929 }
 0x790   :  { %v906_v59 = vmul.f32 %v1930_v31, %v901_v24  ;;  %941 = vmatprep.mubr.bf16.mxu0 %v908_v12  ;;  %v2636_v12 = vld [vmem:[%s2796_s4 + $0x50] sm:$0xff]   ;;  %v2650_v24 = vld [vmem:[%s2796_s4 + $0x58] sm:$0xff]  }
 0x791   :  { %v2643_v31 = vld [vmem:[%s2796_s4 + $0x10] sm:$0xff]  }
 0x792   :  { %v907_v1 = vpack.c.bf16 %v906_v59, %v906_v59  ;;  %v2657_v59 = vld [vmem:[%s2796_s4 + $0x18] sm:$0xff]  }
 0x794   :  { %942 = vmatmul.mubr.bf16.vlgmr.msra.gmra.mrb[24].mxu0 %v907_v1  ;;  %1781 = vmatmul.mubr.bf16.vlgmr.msra.gmra.mrb[20].mxu1 %v907_v1  ;;  %v2664_v1 = vld [vmem:[%s2796_s4 + $0x60] sm:$0xff]  }
 0x795   :  { %1571 = vmatpush3.bf16.msra.mxu0 %v2156_v14  ;;  %1785 = vmatpush3.bf16.msra.mxu1 %v2514_v57  ;;  %v2525_v14 = vld [vmem:[%s2793_s2 + $0x8] sm:$0xff]  }
 0x796   :  { %1572 = vmatprep.subr.bf16.mxu0 %v2162_v15  ;;  %1786 = vmatprep.subr.bf16.mxu1 %v2013_v0  ;;  %v2534_v15 = vld [vmem:[%s2793_s2 + $0x10] sm:$0xff]  }
 0x797   :  { %1800 = vmatprep.mubr.msk.bf16.mxu1 %vm2014_vm0, %v2013_v0 }
 0x799   :  { %1573 = vmatpush3.bf16.msra.mxu0 %v2168_v16  ;;  %1787 = vmatpush3.bf16.msra.mxu1 %v2525_v14  ;;  %v2543_v16 = vld [vmem:[%s2793_s2 + $0x18] sm:$0xff]  }
 0x79a   :  { %1574 = vmatprep.subr.bf16.mxu0 %v2174_v17  ;;  %1788 = vmatprep.subr.bf16.mxu1 %v2013_v0  ;;  %v2552_v17 = vld [vmem:[%s2793_s2 + $0x20] sm:$0xff]  }
 0x79d   :  { %1575 = vmatpush3.bf16.msra.mxu0 %v2193_v32  ;;  %1789 = vmatpush3.bf16.msra.mxu1 %v2534_v15  ;;  %v2561_v32 = vld [vmem:[%s2793_s2 + $0x28] sm:$0xff]  }
 0x79e   :  { %1576 = vmatprep.subr.bf16.mxu0 %v2199_v34  ;;  %1790 = vmatprep.subr.bf16.mxu1 %v2013_v0  ;;  %v2570_v34 = vld [vmem:[%s2793_s2 + $0x30] sm:$0xff]  }
 0x7a1   :  { %1577 = vmatpush3.bf16.msra.mxu0 %v2205_v36  ;;  %1791 = vmatpush3.bf16.msra.mxu1 %v2543_v16  ;;  %v2579_v36 = vld [vmem:[%s2793_s2 + $0x38] sm:$0xff]  }
 0x7a2   :  { %1578 = vmatprep.subr.bf16.mxu0 %v2211_v37  ;;  %1792 = vmatprep.subr.bf16.mxu1 %v2013_v0  ;;  %v2585_v37 = vld [vmem:[%s2796_s4 + $0x40] sm:$0xff]  }
 0x7a5   :  { %1579 = vmatpush3.bf16.msra.mxu0 %v2216_v38  ;;  %1793 = vmatpush3.bf16.msra.mxu1 %v2552_v17  ;;  %v136_v38 = vadd.f32 %v2187_v22, %v2318_v63 }
 0x7a6   :  { %1580 = vmatprep.subr.bf16.mxu0 %v2226_v40  ;;  %1794 = vmatprep.subr.bf16.mxu1 %v2013_v0 }
 0x7a9   :  { %1581 = vmatpush3.bf16.msra.mxu0 %v2238_v43  ;;  %1795 = vmatpush3.bf16.msra.mxu1 %v2561_v32 }
 0x7aa   :  { %1582 = vmatprep.subr.bf16.mxu0 %v2245_v45  ;;  %1796 = vmatprep.subr.bf16.mxu1 %v2013_v0 }
 0x7ad   :  { %1583 = vmatpush3.bf16.msra.mxu0 %v2254_v48  ;;  %1797 = vmatpush3.bf16.msra.mxu1 %v2570_v34 }
 0x7ae   :  { %1584 = vmatprep.subr.bf16.mxu0 %v2262_v49  ;;  %1798 = vmatprep.subr.bf16.mxu1 %v2013_v0 }
 0x7b1   :  { %1585 = vmatpush3.bf16.msra.mxu0 %v2269_v50  ;;  %1799 = vmatpush3.bf16.msra.mxu1 %v2579_v36 }
 0x7b2   :  { %1601 = vmatprep.subr.bf16.mxu0 %v2585_v37  ;;  %1804 = vmatprep.subr.bf16.mxu1 %v2013_v0 }
 0x867   :  { %v1555_v40 = vpop.f32.mrb[24].mxu0  ;;  %v1003_v43 = vpop.f32.mrb[20].mxu1 }
 0x868   :  { %v1009_v45 = vadd.f32 %v1003_v43, %v136_v38  ;;  %v1556_v48 = vpop.f32.mrb[25].mxu0  ;;  %v1782_v49 = vpop.f32.mrb[21].mxu1  ;;  %v2713_v38 = vld [vmem:[%s2796_s4 + $0x38] sm:$0xff]  }
 0x869   :  { %v1557_v50 = vadd.f32 %v1556_v48, %v1555_v40  ;;  %v1558_v2 = vpop.f32.mrb[26].mxu0  ;;  %v1006_v3 = vpop.f32.mrb[22].mxu1 }
 0x86a   :  { %v1393_v7 = vmul.f32 -1.442695, %v1009_v45  ;;  %v1559_v8 = vpop.f32.mrb[27].mxu0  ;;  %v1783_v9 = vpop.f32.mrb[23].mxu1 }
 0x86b   :  { %v944_v10 = vadd.f32 %v1557_v50, %v2325_v19 }
 0x86c   :  { %1931 = vpow2.f32 %v1393_v7 }
 0x86d   :  { %v1392_v39 = vmul.f32 -1.442695, %v944_v10 }
 0x86f   :  { %1933 = vpow2.f32 %v1392_v39 }
 0x870   :  { %1935 = vtanh.f32 %v944_v10 }
 0x876   :  { %v1932_v25 = vpop.eup %1931 }
 0x877   :  { %v1014_v27 = vadd.f32 1.0, %v1932_v25 }
 0x879   :  { %v1934_v26 = vpop.eup %1933 }
 0x87a   :  { %v953_v22 = vadd.f32 1.0, %v1934_v26  ;;  %v1936_v63 = vpop.eup %1935 }
 0x87c   :  { %1937 = vrcp.f32 %v953_v22 }
 0x87d   :  { %1939 = vrcp.f32 %v1014_v27 }
 0x87e   :  { %1941 = vtanh.f32 %v1009_v45 }
 0x886   :  { %v1938_v28 = vpop.eup %1937 }
 0x887   :  { %v956_v11 = vsel %vm2231_vm4, %v1936_v63, %v1938_v28  ;;  %v1940_v13 = vpop.eup %1939 }
 0x888   :  { %959 = vrot.lane.b32.xlu0 %v956_v11, %s2018_s14  ;;  %957 = vrot.lane.b32.xlu1 %v956_v11, %s2017_s9  ;;  %v1942_v29 = vpop.eup %1941 }
 0x889   :  { %v1017_v30 = vsel %vm2231_vm4, %v1942_v29, %v1940_v13 }
 0x88c   :  { %1020 = vrot.lane.b32.xlu0 %v1017_v30, %s2018_s14  ;;  %1018 = vrot.lane.b32.xlu1 %v1017_v30, %s2017_s9 }
 0x890   :  { %1022 = vrot.lane.b32.xlu0 %v1017_v30, %s2016_s8  ;;  %961 = vrot.lane.b32.xlu1 %v956_v11, %s2016_s8 }
 0x8fa   :  { %v960_v20 = vpop.permute.xlu0 %959  ;;  %v958_v61 = vpop.permute.xlu1 %957 }
 0x8fb   :  { %v964_v55 = vmul.f32 %v960_v20, %v956_v11  ;;  %v963_v21 = vmul.f32 %v958_v61, %v2503_v53 }
 0x8fd   :  { %v2603_v33 = vadd.f32 %v964_v55, %v963_v21 }
 0x8fe   :  { %v1021_v35 = vpop.permute.xlu0 %1020  ;;  %v1019_v41 = vpop.permute.xlu1 %1018 }
 0x8ff   :  { %1943 = vtanh.f32 %v2603_v33  ;;  %v1025_v44 = vmul.f32 %v1021_v35, %v1017_v30  ;;  %v1024_v46 = vmul.f32 %v1019_v41, %v2507_v4  ;;  %v2620_v4 = vld [vmem:[%s2796_s4 + $0x48] sm:$0xff]  }
 0x901   :  { %v2607_v47 = vadd.f32 %v1025_v44, %v1024_v46 }
 0x902   :  { %v962_v52 = vpop.permute.xlu1 %961  ;;  %v1023_v58 = vpop.permute.xlu0 %1022 }
 0x903   :  { %1945 = vtanh.f32 %v2607_v47 }
 0x909   :  { %v1944_v51 = vpop.eup %1943 }
 0x90a   :  { %v967_v23 = vmul.f32 %v1944_v51, %v962_v52 }
 0x90c   :  { %v1030_v54 = vpack.c.bf16 %v967_v23, %v967_v23 }
 0x90d   :  { %v1946_v56 = vpop.eup %1945 }
 0x90e   :  { %v1028_v53 = vmul.f32 %v1946_v56, %v1023_v58  ;;  %1063 = vmatprep.mubr.bf16.mxu0 %v1030_v54 }
 0x910   :  { %v1029_v18 = vpack.c.bf16 %v1028_v53, %v1028_v53 }
 0x912   :  { %1064 = vmatmul.mubr.bf16.vlgmr.msra.gmra.mrb[28].mxu0 %v1029_v18  ;;  %1801 = vmatmul.mubr.bf16.vlgmr.msra.gmra.mrb[24].mxu1 %v1029_v18 }
 0x913   :  { %1602 = vmatpush3.bf16.msra.mxu0 %v2613_v5  ;;  %1805 = vmatpush3.bf16.msra.mxu1 %v2514_v57  ;;  %v2671_v57 = vld [vmem:[%s2796_s4 + $0x20] sm:$0xff]  }
 0x914   :  { %1603 = vmatprep.subr.bf16.mxu0 %v2620_v4  ;;  %1806 = vmatprep.subr.bf16.mxu1 %v2013_v0 }
 0x915   :  { %1820 = vmatprep.mubr.msk.bf16.mxu1 %vm2014_vm0, %v2013_v0 }
 0x917   :  { %1604 = vmatpush3.bf16.msra.mxu0 %v2629_v6  ;;  %1807 = vmatpush3.bf16.msra.mxu1 %v2525_v14  ;;  %v2678_v14 = vld [vmem:[%s2796_s4 + $0x68] sm:$0xff]  }
 0x918   :  { %1605 = vmatprep.subr.bf16.mxu0 %v2636_v12  ;;  %1808 = vmatprep.subr.bf16.mxu1 %v2013_v0 }
 0x91b   :  { %1606 = vmatpush3.bf16.msra.mxu0 %v2643_v31  ;;  %1809 = vmatpush3.bf16.msra.mxu1 %v2534_v15  ;;  %v2685_v15 = vld [vmem:[%s2796_s4 + $0x28] sm:$0xff]  }
 0x91c   :  { %1607 = vmatprep.subr.bf16.mxu0 %v2650_v24  ;;  %1810 = vmatprep.subr.bf16.mxu1 %v2013_v0 }
 0x91f   :  { %1608 = vmatpush3.bf16.msra.mxu0 %v2657_v59  ;;  %1811 = vmatpush3.bf16.msra.mxu1 %v2543_v16  ;;  %v2692_v16 = vld [vmem:[%s2796_s4 + $0x70] sm:$0xff]  }
 0x920   :  { %1609 = vmatprep.subr.bf16.mxu0 %v2664_v1  ;;  %1812 = vmatprep.subr.bf16.mxu1 %v2013_v0 }
 0x923   :  { %1610 = vmatpush3.bf16.msra.mxu0 %v2671_v57  ;;  %1813 = vmatpush3.bf16.msra.mxu1 %v2552_v17  ;;  %v2699_v17 = vld [vmem:[%s2796_s4 + $0x30] sm:$0xff]  }
 0x924   :  { %1611 = vmatprep.subr.bf16.mxu0 %v2678_v14  ;;  %1814 = vmatprep.subr.bf16.mxu1 %v2013_v0 }
 0x927   :  { %1612 = vmatpush3.bf16.msra.mxu0 %v2685_v15  ;;  %1815 = vmatpush3.bf16.msra.mxu1 %v2561_v32  ;;  %v2706_v32 = vld [vmem:[%s2796_s4 + $0x78] sm:$0xff]  }
 0x928   :  { %1613 = vmatprep.subr.bf16.mxu0 %v2692_v16  ;;  %1816 = vmatprep.subr.bf16.mxu1 %v2013_v0 }
 0x92b   :  { %1614 = vmatpush3.bf16.msra.mxu0 %v2699_v17  ;;  %1817 = vmatpush3.bf16.msra.mxu1 %v2570_v34  ;;  %v2721_v34 = vld [vmem:[%s2797_s3] ss:$0 sm:$0xff] }
 0x92c   :  { %1615 = vmatprep.subr.bf16.mxu0 %v2706_v32  ;;  %1818 = vmatprep.subr.bf16.mxu1 %v2013_v0  ;;  %v141_v40 = vadd.f32 %v2721_v34, %v2312_v60 }
 0x92f   :  { %1616 = vmatpush3.bf16.msra.mxu0 %v2713_v38  ;;  %1819 = vmatpush3.bf16.msra.mxu1 %v2579_v36 }
 0x930   :  { %1632 = vmatprep.subr.bf16.mxu0 %v2585_v37 }
 0x9e5   :  { %v1586_v0 = vpop.f32.mrb[28].mxu0  ;;  %v1125_v43 = vpop.f32.mrb[24].mxu1 }
 0x9e6   :  { %v1131_v45 = vadd.f32 %v1125_v43, %v141_v40  ;;  %v1587_v48 = vpop.f32.mrb[29].mxu0  ;;  %v1802_v49 = vpop.f32.mrb[25].mxu1 }
 0x9e7   :  { %v1588_v50 = vadd.f32 %v1587_v48, %v1586_v0  ;;  %v1589_v2 = vpop.f32.mrb[30].mxu0  ;;  %v1128_v3 = vpop.f32.mrb[26].mxu1 }
 0x9e8   :  { %v1395_v7 = vmul.f32 -1.442695, %v1131_v45  ;;  %v1590_v36 = vpop.f32.mrb[31].mxu0  ;;  %v1803_v8 = vpop.f32.mrb[27].mxu1 }
 0x9e9   :  { %v1066_v37 = vadd.f32 %v1588_v50, %v2325_v19 }
 0x9ea   :  { %1947 = vpow2.f32 %v1395_v7 }
 0x9eb   :  { %v1394_v9 = vmul.f32 -1.442695, %v1066_v37 }
 0x9ed   :  { %1949 = vpow2.f32 %v1394_v9 }
 0x9ee   :  { %1951 = vtanh.f32 %v1066_v37 }
 0x9f4   :  { %v1948_v10 = vpop.eup %1947 }
 0x9f5   :  { %v1136_v25 = vadd.f32 1.0, %v1948_v10 }
 0x9f7   :  { %v1950_v39 = vpop.eup %1949 }
 0x9f8   :  { %v1075_v60 = vadd.f32 1.0, %v1950_v39  ;;  %v1952_v26 = vpop.eup %1951 }
 0x9fa   :  { %1953 = vrcp.f32 %v1075_v60 }
 0x9fb   :  { %1955 = vrcp.f32 %v1136_v25 }
 0x9fc   :  { %1957 = vtanh.f32 %v1131_v45 }
 0xa04   :  { %v1954_v27 = vpop.eup %1953 }
 0xa05   :  { %v1078_v22 = vsel %vm2231_vm4, %v1952_v26, %v1954_v27  ;;  %v1956_v63 = vpop.eup %1955 }
 0xa06   :  { %1081 = vrot.lane.b32.xlu0 %v1078_v22, %s2018_s14  ;;  %1079 = vrot.lane.b32.xlu1 %v1078_v22, %s2017_s9  ;;  %v1958_v19 = vpop.eup %1957 }
 0xa07   :  { %v1139_v28 = vsel %vm2231_vm4, %v1958_v19, %v1956_v63 }
 0xa0a   :  { %1142 = vrot.lane.b32.xlu0 %v1139_v28, %s2018_s14  ;;  %1140 = vrot.lane.b32.xlu1 %v1139_v28, %s2017_s9 }
 0xa0e   :  { %1144 = vrot.lane.b32.xlu0 %v1139_v28, %s2016_s8  ;;  %1083 = vrot.lane.b32.xlu1 %v1078_v22, %s2016_s8 }
 0xa78   :  { %v1082_v11 = vpop.permute.xlu0 %1081  ;;  %v1080_v13 = vpop.permute.xlu1 %1079 }
 0xa79   :  { %v1086_v29 = vmul.f32 %v1082_v11, %v1078_v22  ;;  %v1085_v30 = vmul.f32 %v1080_v13, %v2603_v33 }
 0xa7b   :  { %v2737_v20 = vadd.f32 %v1086_v29, %v1085_v30 }
 0xa7c   :  { %v1143_v61 = vpop.permute.xlu0 %1142  ;;  %v1141_v55 = vpop.permute.xlu1 %1140 }
 0xa7d   :  { %1959 = vtanh.f32 %v2737_v20  ;;  %v1147_v21 = vmul.f32 %v1143_v61, %v1139_v28  ;;  %v1146_v35 = vmul.f32 %v1141_v55, %v2607_v47  ;;  %v144_v47 = vadd.f32 %v2721_v34, %v2316_v62 }
 0xa7f   :  { %v2741_v41 = vadd.f32 %v1147_v21, %v1146_v35 }
 0xa80   :  { %v1084_v46 = vpop.permute.xlu1 %1083  ;;  %v1145_v54 = vpop.permute.xlu0 %1144 }
 0xa81   :  { %1961 = vtanh.f32 %v2741_v41 }
 0xa87   :  { %v1960_v44 = vpop.eup %1959 }
 0xa88   :  { %v1089_v51 = vmul.f32 %v1960_v44, %v1084_v46 }
 0xa8a   :  { %v1152_v52 = vpack.c.bf16 %v1089_v51, %v1089_v51 }
 0xa8b   :  { %v1962_v23 = vpop.eup %1961 }
 0xa8c   :  { %v1150_v33 = vmul.f32 %v1962_v23, %v1145_v54  ;;  %1185 = vmatprep.mubr.bf16.mxu0 %v1152_v52 }
 0xa8e   :  { %v1151_v56 = vpack.c.bf16 %v1150_v33, %v1150_v33 }
 0xa90   :  { %1186 = vmatmul.mubr.bf16.vlgmr.msra.gmra.mrb[32].mxu0 %v1151_v56  ;;  %1821 = vmatmul.mubr.bf16.vlgmr.msra.gmra.mrb[28].mxu1 %v1151_v56 }
 0xa91   :  { %1633 = vmatpush3.bf16.msra.mxu0 %v2613_v5 }
 0xa92   :  { %1634 = vmatprep.subr.bf16.mxu0 %v2620_v4 }
 0xa95   :  { %1635 = vmatpush3.bf16.msra.mxu0 %v2629_v6 }
 0xa96   :  { %1636 = vmatprep.subr.bf16.mxu0 %v2636_v12 }
 0xa99   :  { %1637 = vmatpush3.bf16.msra.mxu0 %v2643_v31 }
 0xa9a   :  { %1638 = vmatprep.subr.bf16.mxu0 %v2650_v24 }
 0xa9d   :  { %1639 = vmatpush3.bf16.msra.mxu0 %v2657_v59 }
 0xa9e   :  { %1640 = vmatprep.subr.bf16.mxu0 %v2664_v1 }
 0xaa1   :  { %1641 = vmatpush3.bf16.msra.mxu0 %v2671_v57  ;;  %v2012_v57 = vld [vmem:[%s2798_s5] ss:$0 sm:$0xff] }
 0xaa2   :  { %1642 = vmatprep.subr.bf16.mxu0 %v2678_v14 }
 0xaa5   :  { %1643 = vmatpush3.bf16.msra.mxu0 %v2685_v15 }
 0xaa6   :  { %1644 = vmatprep.subr.bf16.mxu0 %v2692_v16 }
 0xaa9   :  { %1645 = vmatpush3.bf16.msra.mxu0 %v2699_v17 }
 0xaaa   :  { %1646 = vmatprep.subr.bf16.mxu0 %v2706_v32 }
 0xaad   :  { %1647 = vmatpush3.bf16.msra.mxu0 %v2713_v38 }
 0xb63   :  { %v1617_v58 = vpop.f32.mrb[32].mxu0  ;;  %v1247_v53 = vpop.f32.mrb[28].mxu1 }
 0xb64   :  { %v1253_v18 = vadd.f32 %v1247_v53, %v144_v47  ;;  %v1618_v5 = vpop.f32.mrb[33].mxu0  ;;  %v1822_v4 = vpop.f32.mrb[29].mxu1 }
 0xb65   :  { %v1619_v6 = vadd.f32 %v1618_v5, %v1617_v58  ;;  %v1620_v12 = vpop.f32.mrb[34].mxu0  ;;  %v1250_v31 = vpop.f32.mrb[30].mxu1 }
 0xb66   :  { %v1397_v24 = vmul.f32 -1.442695, %v1253_v18  ;;  %v1621_v59 = vpop.f32.mrb[35].mxu0  ;;  %v1823_v1 = vpop.f32.mrb[31].mxu1 }
 0xb67   :  { %v1188_v14 = vadd.f32 %v2012_v57, %v1619_v6 }
 0xb68   :  { %1963 = vpow2.f32 %v1397_v24 }
 0xb69   :  { %v1396_v15 = vmul.f32 -1.442695, %v1188_v14 }
 0xb6b   :  { %1965 = vpow2.f32 %v1396_v15 }
 0xb6c   :  { %1967 = vtanh.f32 %v1188_v14 }
 0xb72   :  { %v1964_v62 = vpop.eup %1963 }
 0xb73   :  { %v1258_v17 = vadd.f32 1.0, %v1964_v62 }
 0xb75   :  { %v1966_v16 = vpop.eup %1965 }
 0xb76   :  { %v1197_v32 = vadd.f32 1.0, %v1966_v16  ;;  %v1968_v38 = vpop.eup %1967 }
 0xb78   :  { %1969 = vrcp.f32 %v1197_v32 }
 0xb79   :  { %1971 = vrcp.f32 %v1258_v17 }
 0xb7a   :  { %1973 = vtanh.f32 %v1253_v18 }
 0xb82   :  { %v1970_v34 = vpop.eup %1969 }
 0xb83   :  { %v1200_v40 = vsel %vm2231_vm4, %v1968_v38, %v1970_v34  ;;  %v1972_v0 = vpop.eup %1971 }
 0xb84   :  { %1203 = vrot.lane.b32.xlu0 %v1200_v40, %s2018_s14  ;;  %1201 = vrot.lane.b32.xlu1 %v1200_v40, %s2017_s9  ;;  %v1974_v43 = vpop.eup %1973 }
 0xb85   :  { %v1261_v45 = vsel %vm2231_vm4, %v1974_v43, %v1972_v0 }
 0xb88   :  { %1264 = vrot.lane.b32.xlu0 %v1261_v45, %s2018_s14  ;;  %1262 = vrot.lane.b32.xlu1 %v1261_v45, %s2017_s9 }
 0xb8c   :  { %1266 = vrot.lane.b32.xlu0 %v1261_v45, %s2016_s8  ;;  %1205 = vrot.lane.b32.xlu1 %v1200_v40, %s2016_s8 }
 0xbf6   :  { %v1204_v48 = vpop.permute.xlu0 %1203  ;;  %v1202_v49 = vpop.permute.xlu1 %1201 }
 0xbf7   :  { %v1208_v50 = vmul.f32 %v1204_v48, %v1200_v40  ;;  %v1207_v2 = vmul.f32 %v1202_v49, %v2737_v20 }
 0xbf9   :  { %v1209_v3 = vadd.f32 %v1208_v50, %v1207_v2 }
 0xbfa   :  { %v1265_v7 = vpop.permute.xlu0 %1264  ;;  %v1263_v36 = vpop.permute.xlu1 %1262 }
 0xbfb   :  { %1975 = vtanh.f32 %v1209_v3  ;;  %v1269_v8 = vmul.f32 %v1265_v7, %v1261_v45  ;;  %v1268_v37 = vmul.f32 %v1263_v36, %v2741_v41 }
 0xbfd   :  { %v1270_v9 = vadd.f32 %v1269_v8, %v1268_v37 }
 0xbfe   :  { %v1206_v39 = vpop.permute.xlu1 %1205  ;;  %v1267_v27 = vpop.permute.xlu0 %1266 }
 0xbff   :  { %1977 = vtanh.f32 %v1270_v9  ;;  %1274 = vst [vmem:[%s2799_s7] sm:$0xff] %v1270_v9 }
 0xc05   :  { %v1976_v10 = vpop.eup %1975 }
 0xc06   :  { %v1211_v25 = vmul.f32 %v1976_v10, %v1206_v39 }
 0xc08   :  { %v1276_v60 = vpack.c.bf16 %v1211_v25, %v1211_v25 }
 0xc09   :  { %v1978_v26 = vpop.eup %1977 }
 0xc0a   :  { %v1272_v22 = vmul.f32 %v1978_v26, %v1267_v27  ;;  %1309 = vmatprep.mubr.bf16.mxu0 %v1276_v60 }
 0xc0c   :  { %1273 = vst [vmem:[%s2800_s6] sm:$0xff] %v1272_v22  ;;  %v1275_v63 = vpack.c.bf16 %v1272_v22, %v1272_v22 }
 0xc0e   :  { %1310 = vmatmul.mubr.bf16.vlgmr.msra.gmra.mrb[36].mxu0 %v1275_v63 }
 0xce1   :  { %v1648_v19 = vpop.f32.mrb[36].mxu0 }
 0xce2   :  { %v1649_v28 = vpop.f32.mrb[37].mxu0 }
 0xce3   :  { %v1650_v11 = vadd.f32 %v1649_v28, %v1648_v19  ;;  %v1651_v13 = vpop.f32.mrb[38].mxu0 }
 0xce4   :  { %v1652_v29 = vpop.f32.mrb[39].mxu0 }
 0xce5   :  { %v1312_v30 = vadd.f32 %v2012_v57, %v1650_v11 }
 0xce7   :  { %v1398_v20 = vmul.f32 -1.442695, %v1312_v30 }
 0xce9   :  { %1979 = vpow2.f32 %v1398_v20 }
 0xcea   :  { %1981 = vtanh.f32 %v1312_v30 }
 0xcf3   :  { %v1980_v61 = vpop.eup %1979 }
 0xcf4   :  { %v1321_v55 = vadd.f32 1.0, %v1980_v61  ;;  %v1982_v21 = vpop.eup %1981 }
 0xcf6   :  { %1983 = vrcp.f32 %v1321_v55 }
 0xd00   :  { %v1984_v35 = vpop.eup %1983 }
 0xd01   :  { %v1324_v41 = vsel %vm2231_vm4, %v1982_v21, %v1984_v35 }
 0xd02   :  { %1327 = vrot.lane.b32.xlu0 %v1324_v41, %s2018_s14  ;;  %1325 = vrot.lane.b32.xlu1 %v1324_v41, %s2017_s9 }
 0xd06   :  { %1329 = vrot.lane.b32.xlu1 %v1324_v41, %s2016_s8 }
 0xd74   :  { %v1328_v44 = vpop.permute.xlu0 %1327  ;;  %v1326_v46 = vpop.permute.xlu1 %1325 }
 0xd75   :  { %v1332_v51 = vmul.f32 %v1328_v44, %v1324_v41  ;;  %v1331_v52 = vmul.f32 %v1326_v46, %v1209_v3 }
 0xd77   :  { %v1333_v23 = vadd.f32 %v1332_v51, %v1331_v52 }
 0xd78   :  { %v1330_v33 = vpop.permute.xlu1 %1329 }
 0xd79   :  { %1985 = vtanh.f32 %v1333_v23  ;;  %1400 = vst [vmem:[%s2799_s7 + $0x8] sm:$0xff] %v1333_v23 }
 0xd83   :  { %v1986_v54 = vpop.eup %1985 }
 0xd84   :  { %v1335_v42 = vmul.f32 %v1986_v54, %v1330_v33 }
 0xd86   :  { %1399 = vst [vmem:[%s2800_s6 + $0x8] sm:$0xff] %v1335_v42 }

</bundles_post_ra>
